<compile_context>
chip_gen: v5e
topology: v5e:2x2
jax: 0.10.0
libtpu: 0.0.40
codegen_flags: <defaults>
</compile_context>

<pallas_src>
import functools

import jax
import jax.numpy as jnp
import numpy as np
from jax.experimental import pallas as pl
from jax.experimental.pallas import tpu as pltpu


# ----------------------------------------------------------------------------
# Fused kernel: 1x1 conv + top-k mean pooling + L2 normalizations for a block
# of `bb` batch elements per grid step.
# ----------------------------------------------------------------------------
def head_kernel(x_ref, w_ref, feat_ref, img_ref, *, bb, s, s_pad, topk, eps,
                lane_chunk):
    # x_ref   : (bb*s_pad, C_in) bf16   padded, channels-last trunk features
    # w_ref   : (C_in, D)        bf16   1x1-conv weight (transposed), VMEM-resident
    # feat_ref: (bb, s, D)       bf16   normalized, permuted feature map
    # img_ref : (bb, 1, D)       f32    normalized image embeddings
    d = w_ref.shape[1]
    eps2 = jnp.float32(eps * eps)
    inv_k = jnp.float32(1.0 / topk)

    # 1x1 conv == channel matmul (MXU, bf16 in, f32 accumulate), all bb elements
    # at once so the M dimension is bb*s_pad rows.
    proj = jnp.dot(x_ref[...], w_ref[...],
                   preferred_element_type=jnp.float32)          # (bb*s_pad, d)

    # F.normalize over the channel axis (channels are already last, so this is a
    # per-row normalize).  Padding rows normalize to zero and are never stored.
    sq = jnp.sum(proj * proj, axis=1, keepdims=True)            # (bb*s_pad, 1)
    normed = proj * jax.lax.rsqrt(jnp.maximum(sq, eps2))

    for b in range(bb):
        r0 = b * s_pad                      # sublane-aligned start of this element
        feat_ref[b] = normed[r0:r0 + s, :].astype(feat_ref.dtype)

        # images[b] = mean of the top-k conv activations per channel over the s
        # spatial positions (mean of gathered top-k == mean of the k largest;
        # order-invariant).  Lane-chunked so work/acc fit in a few vregs.
        chunks = []
        for c0 in range(0, d, lane_chunk):
            work = proj[r0:r0 + s, c0:c0 + lane_chunk]           # (s, chunk) f32
            acc = jnp.zeros((1, work.shape[1]), jnp.float32)
            for _ in range(topk):
                m = jnp.max(work, axis=0, keepdims=True)         # (1, chunk)
                acc = acc + m
                # Mask every occurrence of the max (torch.topk keeps tie
                # multiplicity; differs only on exact f32 ties -- accepted).
                work = jnp.where(work == m, -jnp.inf, work)
            chunks.append(acc)
        mean_b = jnp.concatenate(chunks, axis=1) * inv_k          # (1, d)
        isq = jnp.sum(mean_b * mean_b, axis=1, keepdims=True)     # (1, 1)
        img_ref[b] = mean_b * jax.lax.rsqrt(jnp.maximum(isq, eps2))


def _pick_batch_block(batch, rows_per_elem, target_rows=256):
    """Largest divisor of `batch` whose block stays near `target_rows` MXU rows,
    preferring an even number of grid steps (v7x runs two TensorCores)."""
    max_bb = max(1, target_rows // rows_per_elem)
    divs = [d for d in range(1, batch + 1) if batch % d == 0 and d <= max_bb]
    even = [d for d in divs if (batch // d) % 2 == 0]
    return max(even) if even else max(divs)


def custom_resnet152_forward(feat_map, conv_w, *, topk=10, eps=1e-12,
                             target_rows=256):
    """Forward of the CustomResNet152 head.

    feat_map : (B, C_in, H, W) f32  - output of the frozen resnet152 trunk
    conv_w   : (D, C_in)       f32  - 1x1 conv weight (no bias)
    returns  : images (B, D) f32, features (B, H*W, D) bf16   [torch return order]
    """
    B, C_in, H, W = feat_map.shape
    S = H * W
    D = conv_w.shape[0]
    assert S >= topk, "top-k needs at least k spatial positions"

    S_pad = ((S + 7) // 8) * 8                       # 49 -> 56, sublane aligned
    bb = _pick_batch_block(B, S_pad, target_rows)
    lane_chunk = 256 if D % 256 == 0 else (128 if D % 128 == 0 else D)

    # Layout plumbing (single fused XLA pass): channels-last, pad spatial, cast bf16.
    x = jnp.transpose(feat_map.reshape(B, C_in, S), (0, 2, 1))   # (B, S, C_in)
    x = jnp.pad(x, ((0, 0), (0, S_pad - S), (0, 0)))             # (B, S_pad, C_in)
    x = x.astype(jnp.bfloat16).reshape(B * S_pad, C_in)
    w = jnp.transpose(conv_w).astype(jnp.bfloat16)               # (C_in, D)

    kernel = functools.partial(head_kernel, bb=bb, s=S, s_pad=S_pad, topk=topk,
                               eps=eps, lane_chunk=lane_chunk)

    cost = pl.CostEstimate(
        flops=2 * B * S_pad * C_in * D,
        transcendentals=B * (S + 1),
        bytes_accessed=(x.size * 2 + w.size * 2 + B * S * D * 2 + B * D * 4))

    feats, images = pl.pallas_call(
        kernel,
        grid=(B // bb,),
        in_specs=(
            pl.BlockSpec((bb * S_pad, C_in), lambda i: (i, 0)),  # per-step input slab
            pl.BlockSpec((C_in, D), lambda i: (0, 0)),           # resident weight
        ),
        out_specs=(
            pl.BlockSpec((bb, S, D), lambda i: (i, 0, 0)),       # lane-dense features
            pl.BlockSpec((bb, 1, D), lambda i: (i, 0, 0)),       # image embeddings
        ),
        out_shape=(
            jax.ShapeDtypeStruct((B, S, D), jnp.bfloat16),
            jax.ShapeDtypeStruct((B, 1, D), jnp.float32),
        ),
        compiler_params=pltpu.CompilerParams(
            dimension_semantics=("parallel",)),
        cost_estimate=cost,
    )(x, w)

    return images.reshape(B, D), feats


# ----------------------------------------------------------------------------
# Pure-JAX reference (mirrors the torch forward exactly) for correctness check.
# ----------------------------------------------------------------------------
def reference_head(feat_map, conv_w, *, topk=10, eps=1e-12):
    B, C_in, H, W = feat_map.shape
    D = conv_w.shape[0]
    feats = jnp.einsum('bchw,dc->bdhw', feat_map, conv_w).reshape(B, D, H * W)
    top_vals, _ = jax.lax.top_k(feats, topk)                 # (B, D, k)
    images = jnp.mean(top_vals, axis=2)                      # (B, D)
    fnorm = jnp.sqrt(jnp.sum(feats * feats, axis=1, keepdims=True))
    feats_n = feats / jnp.maximum(fnorm, eps)
    feats_n = jnp.transpose(feats_n, (0, 2, 1))              # (B, 49, D)
    inorm = jnp.sqrt(jnp.sum(images * images, axis=1, keepdims=True))
    images_n = images / jnp.maximum(inorm, eps)
    return images_n, feats_n


if __name__ == "__main__":
    # Spatial map is fixed at 7x7 (=49) / topk=10 by the module; channel dims shrunk
    # for the demo.  B=4 exercises batch blocking (bb=2 -> 2 parallel grid steps).
    B, C_in, H, W, D, K = 4, 256, 7, 7, 128, 10

    key = jax.random.PRNGKey(0)
    k1, k2 = jax.random.split(key)
    feat_map = jax.random.normal(k1, (B, C_in, H, W), dtype=jnp.float32)
    conv_w = jax.random.normal(k2, (D, C_in), dtype=jnp.float32) / np.sqrt(C_in)

    images, features = custom_resnet152_forward(feat_map, conv_w, topk=K)
    images, features = jax.block_until_ready((images, features))

    # Reference consumes the same bf16-rounded operands the kernel used.
    xq = feat_map.astype(jnp.bfloat16).astype(jnp.float32)
    wq = conv_w.astype(jnp.bfloat16).astype(jnp.float32)
    ref_images, ref_features = reference_head(xq, wq, topk=K)

    np.testing.assert_allclose(np.asarray(images), np.asarray(ref_images),
                               rtol=5e-3, atol=5e-3)
    np.testing.assert_allclose(np.asarray(features.astype(jnp.float32)),
                               np.asarray(ref_features),
                               rtol=2e-2, atol=1e-2)

    print("KERNEL_OK")
</pallas_src>

<mosaic_0001>
module attributes {stable_mosaic.version = 11 : i64} {
  func.func @head_kernel(%arg0: i32, %arg1: memref<112x256xbf16, #tpu.memory_space<vmem>>, %arg2: memref<256x128xbf16, #tpu.memory_space<vmem>>, %arg3: memref<2x49x128xbf16, #tpu.memory_space<vmem>>, %arg4: memref<2x1x128xf32, #tpu.memory_space<vmem>>) attributes {dimension_semantics = [#tpu.dimension_semantics<parallel>], iteration_bounds = array<i64: 2>, scalar_prefetch = 0 : i64, scratch_operands = 0 : i64, tpu.core_type = #tpu.core_type<tc>, window_params = [{transform_indices = @transform_0, window_bounds = array<i64: 112, 256>}, {pipeline_mode = #tpu.pipeline_mode<synchronous>, transform_indices = @transform_1, window_bounds = array<i64: 256, 128>}, {transform_indices = @transform_2, window_bounds = array<i64: 2, 49, 128>}, {transform_indices = @transform_3, window_bounds = array<i64: 2, 1, 128>}]} {
    %c0 = arith.constant 0 : index
    %c0_0 = arith.constant 0 : index
    %0 = vector.load %arg1[%c0, %c0_0] : memref<112x256xbf16, #tpu.memory_space<vmem>>, vector<112x256xbf16>
    %c0_1 = arith.constant 0 : index
    %c0_2 = arith.constant 0 : index
    %1 = vector.load %arg2[%c0_1, %c0_2] : memref<256x128xbf16, #tpu.memory_space<vmem>>, vector<256x128xbf16>
    %cst = arith.constant dense<0.000000e+00> : vector<112x128xf32>
    %2 = tpu.matmul %0, %1, %cst {dimension_numbers = #tpu.dot_dimension_numbers<[1], [0], [0], [1], [0, 0, 1, 1], [], []>} : vector<112x256xbf16>, vector<256x128xbf16>, vector<112x128xf32> -> vector<112x128xf32>
    %3 = arith.mulf %2, %2 : vector<112x128xf32>
    %cst_3 = arith.constant dense<0.000000e+00> : vector<112xf32>
    %4 = vector.multi_reduction <add>, %3, %cst_3 [1] : vector<112x128xf32> to vector<112xf32>
    %5 = vector.shape_cast %4 : vector<112xf32> to vector<112x1xf32>
    %cst_4 = arith.constant 1.000000e-24 : f32
    %6 = vector.broadcast %cst_4 : f32 to vector<112x1xf32>
    %7 = arith.maximumf %5, %6 : vector<112x1xf32>
    %8 = math.rsqrt %7 : vector<112x1xf32>
    %9 = vector.broadcast %8 : vector<112x1xf32> to vector<112x128xf32>
    %10 = arith.mulf %2, %9 : vector<112x128xf32>
    %11 = vector.extract_strided_slice %10 {offsets = [0, 0], sizes = [49, 128], strides = [1, 1]} : vector<112x128xf32> to vector<49x128xf32>
    %12 = arith.truncf %11 : vector<49x128xf32> to vector<49x128xbf16>
    %c0_5 = arith.constant 0 : index
    %c0_6 = arith.constant 0 : index
    %c0_7 = arith.constant 0 : index
    %13 = vector.load %arg3[%c0_5, %c0_6, %c0_7] : memref<2x49x128xbf16, #tpu.memory_space<vmem>>, vector<1x49x128xbf16>
    %14 = vector.shape_cast %13 : vector<1x49x128xbf16> to vector<49x128xbf16>
    %15 = vector.shape_cast %12 : vector<49x128xbf16> to vector<1x49x128xbf16>
    tpu.vector_store %arg3[%c0_5, %c0_6, %c0_7], %15 {strides = array<i32>} : memref<2x49x128xbf16, #tpu.memory_space<vmem>>, vector<1x49x128xbf16>,
    %16 = vector.extract_strided_slice %2 {offsets = [0, 0], sizes = [49, 128], strides = [1, 1]} : vector<112x128xf32> to vector<49x128xf32>
    %cst_8 = arith.constant 0.000000e+00 : f32
    %17 = vector.broadcast %cst_8 : f32 to vector<1x128xf32>
    %cst_9 = arith.constant dense<0xFF800000> : vector<128xf32>
    %18 = vector.multi_reduction <maximumf>, %16, %cst_9 [0] : vector<49x128xf32> to vector<128xf32>
    %19 = vector.shape_cast %18 : vector<128xf32> to vector<1x128xf32>
    %20 = arith.addf %17, %19 : vector<1x128xf32>
    %21 = vector.broadcast %19 : vector<1x128xf32> to vector<49x128xf32>
    %22 = arith.cmpf oeq, %16, %21 : vector<49x128xf32>
    %cst_10 = arith.constant 0xFF800000 : f32
    %23 = vector.broadcast %cst_10 : f32 to vector<49x128xf32>
    %24 = arith.select %22, %23, %16 : vector<49x128xi1>, vector<49x128xf32>
    %cst_11 = arith.constant dense<0xFF800000> : vector<128xf32>
    %25 = vector.multi_reduction <maximumf>, %24, %cst_11 [0] : vector<49x128xf32> to vector<128xf32>
    %26 = vector.shape_cast %25 : vector<128xf32> to vector<1x128xf32>
    %27 = arith.addf %20, %26 : vector<1x128xf32>
    %28 = vector.broadcast %26 : vector<1x128xf32> to vector<49x128xf32>
    %29 = arith.cmpf oeq, %24, %28 : vector<49x128xf32>
    %cst_12 = arith.constant 0xFF800000 : f32
    %30 = vector.broadcast %cst_12 : f32 to vector<49x128xf32>
    %31 = arith.select %29, %30, %24 : vector<49x128xi1>, vector<49x128xf32>
    %cst_13 = arith.constant dense<0xFF800000> : vector<128xf32>
    %32 = vector.multi_reduction <maximumf>, %31, %cst_13 [0] : vector<49x128xf32> to vector<128xf32>
    %33 = vector.shape_cast %32 : vector<128xf32> to vector<1x128xf32>
    %34 = arith.addf %27, %33 : vector<1x128xf32>
    %35 = vector.broadcast %33 : vector<1x128xf32> to vector<49x128xf32>
    %36 = arith.cmpf oeq, %31, %35 : vector<49x128xf32>
    %cst_14 = arith.constant 0xFF800000 : f32
    %37 = vector.broadcast %cst_14 : f32 to vector<49x128xf32>
    %38 = arith.select %36, %37, %31 : vector<49x128xi1>, vector<49x128xf32>
    %cst_15 = arith.constant dense<0xFF800000> : vector<128xf32>
    %39 = vector.multi_reduction <maximumf>, %38, %cst_15 [0] : vector<49x128xf32> to vector<128xf32>
    %40 = vector.shape_cast %39 : vector<128xf32> to vector<1x128xf32>
    %41 = arith.addf %34, %40 : vector<1x128xf32>
    %42 = vector.broadcast %40 : vector<1x128xf32> to vector<49x128xf32>
    %43 = arith.cmpf oeq, %38, %42 : vector<49x128xf32>
    %cst_16 = arith.constant 0xFF800000 : f32
    %44 = vector.broadcast %cst_16 : f32 to vector<49x128xf32>
    %45 = arith.select %43, %44, %38 : vector<49x128xi1>, vector<49x128xf32>
    %cst_17 = arith.constant dense<0xFF800000> : vector<128xf32>
    %46 = vector.multi_reduction <maximumf>, %45, %cst_17 [0] : vector<49x128xf32> to vector<128xf32>
    %47 = vector.shape_cast %46 : vector<128xf32> to vector<1x128xf32>
    %48 = arith.addf %41, %47 : vector<1x128xf32>
    %49 = vector.broadcast %47 : vector<1x128xf32> to vector<49x128xf32>
    %50 = arith.cmpf oeq, %45, %49 : vector<49x128xf32>
    %cst_18 = arith.constant 0xFF800000 : f32
    %51 = vector.broadcast %cst_18 : f32 to vector<49x128xf32>
    %52 = arith.select %50, %51, %45 : vector<49x128xi1>, vector<49x128xf32>
    %cst_19 = arith.constant dense<0xFF800000> : vector<128xf32>
    %53 = vector.multi_reduction <maximumf>, %52, %cst_19 [0] : vector<49x128xf32> to vector<128xf32>
    %54 = vector.shape_cast %53 : vector<128xf32> to vector<1x128xf32>
    %55 = arith.addf %48, %54 : vector<1x128xf32>
    %56 = vector.broadcast %54 : vector<1x128xf32> to vector<49x128xf32>
    %57 = arith.cmpf oeq, %52, %56 : vector<49x128xf32>
    %cst_20 = arith.constant 0xFF800000 : f32
    %58 = vector.broadcast %cst_20 : f32 to vector<49x128xf32>
    %59 = arith.select %57, %58, %52 : vector<49x128xi1>, vector<49x128xf32>
    %cst_21 = arith.constant dense<0xFF800000> : vector<128xf32>
    %60 = vector.multi_reduction <maximumf>, %59, %cst_21 [0] : vector<49x128xf32> to vector<128xf32>
    %61 = vector.shape_cast %60 : vector<128xf32> to vector<1x128xf32>
    %62 = arith.addf %55, %61 : vector<1x128xf32>
    %63 = vector.broadcast %61 : vector<1x128xf32> to vector<49x128xf32>
    %64 = arith.cmpf oeq, %59, %63 : vector<49x128xf32>
    %cst_22 = arith.constant 0xFF800000 : f32
    %65 = vector.broadcast %cst_22 : f32 to vector<49x128xf32>
    %66 = arith.select %64, %65, %59 : vector<49x128xi1>, vector<49x128xf32>
    %cst_23 = arith.constant dense<0xFF800000> : vector<128xf32>
    %67 = vector.multi_reduction <maximumf>, %66, %cst_23 [0] : vector<49x128xf32> to vector<128xf32>
    %68 = vector.shape_cast %67 : vector<128xf32> to vector<1x128xf32>
    %69 = arith.addf %62, %68 : vector<1x128xf32>
    %70 = vector.broadcast %68 : vector<1x128xf32> to vector<49x128xf32>
    %71 = arith.cmpf oeq, %66, %70 : vector<49x128xf32>
    %cst_24 = arith.constant 0xFF800000 : f32
    %72 = vector.broadcast %cst_24 : f32 to vector<49x128xf32>
    %73 = arith.select %71, %72, %66 : vector<49x128xi1>, vector<49x128xf32>
    %cst_25 = arith.constant dense<0xFF800000> : vector<128xf32>
    %74 = vector.multi_reduction <maximumf>, %73, %cst_25 [0] : vector<49x128xf32> to vector<128xf32>
    %75 = vector.shape_cast %74 : vector<128xf32> to vector<1x128xf32>
    %76 = arith.addf %69, %75 : vector<1x128xf32>
    %77 = vector.broadcast %75 : vector<1x128xf32> to vector<49x128xf32>
    %78 = arith.cmpf oeq, %73, %77 : vector<49x128xf32>
    %cst_26 = arith.constant 0xFF800000 : f32
    %79 = vector.broadcast %cst_26 : f32 to vector<49x128xf32>
    %80 = arith.select %78, %79, %73 : vector<49x128xi1>, vector<49x128xf32>
    %cst_27 = arith.constant dense<0xFF800000> : vector<128xf32>
    %81 = vector.multi_reduction <maximumf>, %80, %cst_27 [0] : vector<49x128xf32> to vector<128xf32>
    %82 = vector.shape_cast %81 : vector<128xf32> to vector<1x128xf32>
    %83 = arith.addf %76, %82 : vector<1x128xf32>
    %cst_28 = arith.constant 1.000000e-01 : f32
    %84 = vector.broadcast %cst_28 : f32 to vector<1x128xf32>
    %85 = arith.mulf %83, %84 : vector<1x128xf32>
    %86 = arith.mulf %85, %85 : vector<1x128xf32>
    %cst_29 = arith.constant dense<0.000000e+00> : vector<1xf32>
    %87 = vector.multi_reduction <add>, %86, %cst_29 [1] : vector<1x128xf32> to vector<1xf32>
    %88 = vector.shape_cast %87 : vector<1xf32> to vector<1x1xf32>
    %cst_30 = arith.constant 1.000000e-24 : f32
    %89 = vector.broadcast %cst_30 : f32 to vector<1x1xf32>
    %90 = arith.maximumf %88, %89 : vector<1x1xf32>
    %91 = math.rsqrt %90 : vector<1x1xf32>
    %92 = vector.broadcast %91 : vector<1x1xf32> to vector<1x128xf32>
    %93 = arith.mulf %85, %92 : vector<1x128xf32>
    %c0_31 = arith.constant 0 : index
    %c0_32 = arith.constant 0 : index
    %c0_33 = arith.constant 0 : index
    %94 = vector.load %arg4[%c0_31, %c0_32, %c0_33] : memref<2x1x128xf32, #tpu.memory_space<vmem>>, vector<1x1x128xf32>
    %95 = vector.shape_cast %94 : vector<1x1x128xf32> to vector<1x128xf32>
    %96 = vector.shape_cast %93 : vector<1x128xf32> to vector<1x1x128xf32>
    tpu.vector_store %arg4[%c0_31, %c0_32, %c0_33], %96 {strides = array<i32>} : memref<2x1x128xf32, #tpu.memory_space<vmem>>, vector<1x1x128xf32>,
    %97 = vector.extract_strided_slice %10 {offsets = [56, 0], sizes = [49, 128], strides = [1, 1]} : vector<112x128xf32> to vector<49x128xf32>
    %98 = arith.truncf %97 : vector<49x128xf32> to vector<49x128xbf16>
    %c1 = arith.constant 1 : index
    %c0_34 = arith.constant 0 : index
    %c0_35 = arith.constant 0 : index
    %99 = vector.load %arg3[%c1, %c0_34, %c0_35] : memref<2x49x128xbf16, #tpu.memory_space<vmem>>, vector<1x49x128xbf16>
    %100 = vector.shape_cast %99 : vector<1x49x128xbf16> to vector<49x128xbf16>
    %101 = vector.shape_cast %98 : vector<49x128xbf16> to vector<1x49x128xbf16>
    tpu.vector_store %arg3[%c1, %c0_34, %c0_35], %101 {strides = array<i32>} : memref<2x49x128xbf16, #tpu.memory_space<vmem>>, vector<1x49x128xbf16>,
    %102 = vector.extract_strided_slice %2 {offsets = [56, 0], sizes = [49, 128], strides = [1, 1]} : vector<112x128xf32> to vector<49x128xf32>
    %cst_36 = arith.constant 0.000000e+00 : f32
    %103 = vector.broadcast %cst_36 : f32 to vector<1x128xf32>
    %cst_37 = arith.constant dense<0xFF800000> : vector<128xf32>
    %104 = vector.multi_reduction <maximumf>, %102, %cst_37 [0] : vector<49x128xf32> to vector<128xf32>
    %105 = vector.shape_cast %104 : vector<128xf32> to vector<1x128xf32>
    %106 = arith.addf %103, %105 : vector<1x128xf32>
    %107 = vector.broadcast %105 : vector<1x128xf32> to vector<49x128xf32>
    %108 = arith.cmpf oeq, %102, %107 : vector<49x128xf32>
    %cst_38 = arith.constant 0xFF800000 : f32
    %109 = vector.broadcast %cst_38 : f32 to vector<49x128xf32>
    %110 = arith.select %108, %109, %102 : vector<49x128xi1>, vector<49x128xf32>
    %cst_39 = arith.constant dense<0xFF800000> : vector<128xf32>
    %111 = vector.multi_reduction <maximumf>, %110, %cst_39 [0] : vector<49x128xf32> to vector<128xf32>
    %112 = vector.shape_cast %111 : vector<128xf32> to vector<1x128xf32>
    %113 = arith.addf %106, %112 : vector<1x128xf32>
    %114 = vector.broadcast %112 : vector<1x128xf32> to vector<49x128xf32>
    %115 = arith.cmpf oeq, %110, %114 : vector<49x128xf32>
    %cst_40 = arith.constant 0xFF800000 : f32
    %116 = vector.broadcast %cst_40 : f32 to vector<49x128xf32>
    %117 = arith.select %115, %116, %110 : vector<49x128xi1>, vector<49x128xf32>
    %cst_41 = arith.constant dense<0xFF800000> : vector<128xf32>
    %118 = vector.multi_reduction <maximumf>, %117, %cst_41 [0] : vector<49x128xf32> to vector<128xf32>
    %119 = vector.shape_cast %118 : vector<128xf32> to vector<1x128xf32>
    %120 = arith.addf %113, %119 : vector<1x128xf32>
    %121 = vector.broadcast %119 : vector<1x128xf32> to vector<49x128xf32>
    %122 = arith.cmpf oeq, %117, %121 : vector<49x128xf32>
    %cst_42 = arith.constant 0xFF800000 : f32
    %123 = vector.broadcast %cst_42 : f32 to vector<49x128xf32>
    %124 = arith.select %122, %123, %117 : vector<49x128xi1>, vector<49x128xf32>
    %cst_43 = arith.constant dense<0xFF800000> : vector<128xf32>
    %125 = vector.multi_reduction <maximumf>, %124, %cst_43 [0] : vector<49x128xf32> to vector<128xf32>
    %126 = vector.shape_cast %125 : vector<128xf32> to vector<1x128xf32>
    %127 = arith.addf %120, %126 : vector<1x128xf32>
    %128 = vector.broadcast %126 : vector<1x128xf32> to vector<49x128xf32>
    %129 = arith.cmpf oeq, %124, %128 : vector<49x128xf32>
    %cst_44 = arith.constant 0xFF800000 : f32
    %130 = vector.broadcast %cst_44 : f32 to vector<49x128xf32>
    %131 = arith.select %129, %130, %124 : vector<49x128xi1>, vector<49x128xf32>
    %cst_45 = arith.constant dense<0xFF800000> : vector<128xf32>
    %132 = vector.multi_reduction <maximumf>, %131, %cst_45 [0] : vector<49x128xf32> to vector<128xf32>
    %133 = vector.shape_cast %132 : vector<128xf32> to vector<1x128xf32>
    %134 = arith.addf %127, %133 : vector<1x128xf32>
    %135 = vector.broadcast %133 : vector<1x128xf32> to vector<49x128xf32>
    %136 = arith.cmpf oeq, %131, %135 : vector<49x128xf32>
    %cst_46 = arith.constant 0xFF800000 : f32
    %137 = vector.broadcast %cst_46 : f32 to vector<49x128xf32>
    %138 = arith.select %136, %137, %131 : vector<49x128xi1>, vector<49x128xf32>
    %cst_47 = arith.constant dense<0xFF800000> : vector<128xf32>
    %139 = vector.multi_reduction <maximumf>, %138, %cst_47 [0] : vector<49x128xf32> to vector<128xf32>
    %140 = vector.shape_cast %139 : vector<128xf32> to vector<1x128xf32>
    %141 = arith.addf %134, %140 : vector<1x128xf32>
    %142 = vector.broadcast %140 : vector<1x128xf32> to vector<49x128xf32>
    %143 = arith.cmpf oeq, %138, %142 : vector<49x128xf32>
    %cst_48 = arith.constant 0xFF800000 : f32
    %144 = vector.broadcast %cst_48 : f32 to vector<49x128xf32>
    %145 = arith.select %143, %144, %138 : vector<49x128xi1>, vector<49x128xf32>
    %cst_49 = arith.constant dense<0xFF800000> : vector<128xf32>
    %146 = vector.multi_reduction <maximumf>, %145, %cst_49 [0] : vector<49x128xf32> to vector<128xf32>
    %147 = vector.shape_cast %146 : vector<128xf32> to vector<1x128xf32>
    %148 = arith.addf %141, %147 : vector<1x128xf32>
    %149 = vector.broadcast %147 : vector<1x128xf32> to vector<49x128xf32>
    %150 = arith.cmpf oeq, %145, %149 : vector<49x128xf32>
    %cst_50 = arith.constant 0xFF800000 : f32
    %151 = vector.broadcast %cst_50 : f32 to vector<49x128xf32>
    %152 = arith.select %150, %151, %145 : vector<49x128xi1>, vector<49x128xf32>
    %cst_51 = arith.constant dense<0xFF800000> : vector<128xf32>
    %153 = vector.multi_reduction <maximumf>, %152, %cst_51 [0] : vector<49x128xf32> to vector<128xf32>
    %154 = vector.shape_cast %153 : vector<128xf32> to vector<1x128xf32>
    %155 = arith.addf %148, %154 : vector<1x128xf32>
    %156 = vector.broadcast %154 : vector<1x128xf32> to vector<49x128xf32>
    %157 = arith.cmpf oeq, %152, %156 : vector<49x128xf32>
    %cst_52 = arith.constant 0xFF800000 : f32
    %158 = vector.broadcast %cst_52 : f32 to vector<49x128xf32>
    %159 = arith.select %157, %158, %152 : vector<49x128xi1>, vector<49x128xf32>
    %cst_53 = arith.constant dense<0xFF800000> : vector<128xf32>
    %160 = vector.multi_reduction <maximumf>, %159, %cst_53 [0] : vector<49x128xf32> to vector<128xf32>
    %161 = vector.shape_cast %160 : vector<128xf32> to vector<1x128xf32>
    %162 = arith.addf %155, %161 : vector<1x128xf32>
    %163 = vector.broadcast %161 : vector<1x128xf32> to vector<49x128xf32>
    %164 = arith.cmpf oeq, %159, %163 : vector<49x128xf32>
    %cst_54 = arith.constant 0xFF800000 : f32
    %165 = vector.broadcast %cst_54 : f32 to vector<49x128xf32>
    %166 = arith.select %164, %165, %159 : vector<49x128xi1>, vector<49x128xf32>
    %cst_55 = arith.constant dense<0xFF800000> : vector<128xf32>
    %167 = vector.multi_reduction <maximumf>, %166, %cst_55 [0] : vector<49x128xf32> to vector<128xf32>
    %168 = vector.shape_cast %167 : vector<128xf32> to vector<1x128xf32>
    %169 = arith.addf %162, %168 : vector<1x128xf32>
    %cst_56 = arith.constant 1.000000e-01 : f32
    %170 = vector.broadcast %cst_56 : f32 to vector<1x128xf32>
    %171 = arith.mulf %169, %170 : vector<1x128xf32>
    %172 = arith.mulf %171, %171 : vector<1x128xf32>
    %cst_57 = arith.constant dense<0.000000e+00> : vector<1xf32>
    %173 = vector.multi_reduction <add>, %172, %cst_57 [1] : vector<1x128xf32> to vector<1xf32>
    %174 = vector.shape_cast %173 : vector<1xf32> to vector<1x1xf32>
    %cst_58 = arith.constant 1.000000e-24 : f32
    %175 = vector.broadcast %cst_58 : f32 to vector<1x1xf32>
    %176 = arith.maximumf %174, %175 : vector<1x1xf32>
    %177 = math.rsqrt %176 : vector<1x1xf32>
    %178 = vector.broadcast %177 : vector<1x1xf32> to vector<1x128xf32>
    %179 = arith.mulf %171, %178 : vector<1x128xf32>
    %c1_59 = arith.constant 1 : index
    %c0_60 = arith.constant 0 : index
    %c0_61 = arith.constant 0 : index
    %180 = vector.load %arg4[%c1_59, %c0_60, %c0_61] : memref<2x1x128xf32, #tpu.memory_space<vmem>>, vector<1x1x128xf32>
    %181 = vector.shape_cast %180 : vector<1x1x128xf32> to vector<1x128xf32>
    %182 = vector.shape_cast %179 : vector<1x128xf32> to vector<1x1x128xf32>
    tpu.vector_store %arg4[%c1_59, %c0_60, %c0_61], %182 {strides = array<i32>} : memref<2x1x128xf32, #tpu.memory_space<vmem>>, vector<1x1x128xf32>,
    return
  }
  func.func @transform_0(%arg0: i32) -> (i32, i32) {
    %c0_i32 = arith.constant 0 : i32
    %c0_i32_0 = arith.constant 0 : i32
    return %arg0, %c0_i32 : i32, i32
  }
  func.func @transform_1(%arg0: i32) -> (i32, i32) {
    %c0_i32 = arith.constant 0 : i32
    %c0_i32_0 = arith.constant 0 : i32
    %c0_i32_1 = arith.constant 0 : i32
    return %c0_i32, %c0_i32_0 : i32, i32
  }
  func.func @transform_2(%arg0: i32) -> (i32, i32, i32) {
    %c0_i32 = arith.constant 0 : i32
    %c0_i32_0 = arith.constant 0 : i32
    %c0_i32_1 = arith.constant 0 : i32
    return %arg0, %c0_i32, %c0_i32_0 : i32, i32, i32
  }
  func.func @transform_3(%arg0: i32) -> (i32, i32, i32) {
    %c0_i32 = arith.constant 0 : i32
    %c0_i32_0 = arith.constant 0 : i32
    %c0_i32_1 = arith.constant 0 : i32
    return %arg0, %c0_i32, %c0_i32_0 : i32, i32, i32
  }
}

</mosaic_0001>

<bundles_post_ra>
// kernel: tpu_custom_call.1
= control target key start
LH: loop header
LB: loop body
LE: loop exit
PB: predicated region body
PF: predicated region fallthrough
CT: control target
= control target key end

     0   :  { %9 = vsyncpa [#allocation3], 0  ;;  %s2991_s0 = inlined_call_operand.hbm [shape: bf16[224,256], index: 0, kind: input, shape index: {}]   ;;  %s2992_s1 = inlined_call_operand.hbm [shape: bf16[256,128], index: 1, kind: input, shape index: {}]   ;;  %s2993_s2 = inlined_call_operand.vmem [shape: bf16[4,49,128], index: 2, kind: output, shape index: {0}]   ;;  %s2994_s3 = inlined_call_operand.hbm [shape: f32[4,1,128], index: 3, kind: output, shape index: {1}]  }
   0x1   :  { %11 = vsyncpa [#allocation3 + $0x1], 0 }
   0x2   :  { %12 = vsyncpa [#allocation6], 0 }
   0x3   :  { %13 = vsyncpa [#allocation4], 0 }
   0x4   :  { %15 = vsyncpa [#allocation4 + $0x1], 0  ;;  %s1954_s12 = smov 0   ;;  %s1956_s13 = smov 0  }
   0x5   :  { %s1958_s14 = smov 0   ;;  %s1960_s15 = smov 0  }
   0x6 LB: > { %s1975_s16 = sadd.s32 4294967295, %s1925_s15   ;;  %s1475_s17 = sadd.s32 4294967294, %s1925_s15   ;;  %s1925_s15 = sphi %s1960_s15, %s3018_s15   ;;  %s1921_s14 = sphi %s1958_s14, %s3017_s14   ;;  %s1917_s13 = sphi %s1956_s13, %s3016_s13   ;;  %s1913_s12 = sphi %s1954_s12, %s3015_s12  }
   0x7   : > { %p41_p0 = scmp.ne.s32.totalorder %s1917_s13, %s1913_s12  ;;  %p42_p1 = scmp.eq.s32.totalorder %s1975_s16, 0 }
   0x8   : > { %p112_p2 = scmp.eq.s32.totalorder %s1975_s16, 1  ;;  %p118_p3 = scmp.eq.s32.totalorder %s1475_s17, 1 }
   0x9   : > { %p1984_p4 = por %p42_p1, %p41_p0  ;;  %p1476_p5 = scmp.ge.s32.totalorder %s1925_s15, 1 }
   0xa   : > { %p1989_p6 = por %p118_p3, %p41_p0  ;;  %p125_p7 = scmp.lt.s32.totalorder %s1925_s15, 3 }
   0xb   : > { %s136_s22 = sshll.u32 %s2992_s1, 4  ;;  %s1927_s24 = smov [#allocation5]   ;;  %s137_s22 = int_to_ptr.hbm [resolvable:$true] %s136_s22 }
   0xc   : > { %p1997_p8 = pnand %p1476_p5, %p125_p7  ;;  %s138_s25 = sshll.u32 %s1927_s24, 4  ;;  %s139_s25 = int_to_ptr.vmem [resolvable:$true] %s138_s25 }
   0xd   : > { %s2007_s26 = sadd.s32 1, %s1925_s15   ;;  %s1928_s27 = smov 64  }
   0xe   : > { %p1708_p9 = pneg %p1997_p8  ;;  %s1929_s28 = smov 4  }
   0xf   : > { %s25_s29 = ssub.s32 %s1925_s15, %s2007_s26  ;;  %s28_s30 = sadd.s32 1, %s1921_s14 }
  0x10   : > { %p1709_p10 = pnand %p1708_p9, %p42_p1  ;;  %p26_p12 = scmp.eq.s32.totalorder %s25_s29, 0 }
  0x11   : > { %p35_p13 = scmp.ne.s32.totalorder %s1921_s14, %s1917_s13  ;;  %p36_p0 = scmp.eq.s32.totalorder %s1925_s15, 0 }
  0x12   : > { %1711 = dma.hbm_to_vmem [thread:$0]  (!%p1709_p10), %s137_s22, 2048, %s139_s25, [#allocation6], %s1928_s27, %s1928_s27, %s1929_s28  }
  0x13   : > { %p1721_p3 = scmp.lt.s32.totalorder %s1925_s15, 2  ;;  %p37_p5 = por %p36_p0, %p35_p13 }
  0x14   : > { %s2017_s4 = scalar_select %p26_p12, %s1921_s14, %s28_s30  }
  0x15   : > { %p2021_p7 = por %p112_p2, %p35_p13  ;;  %s152_s6 = sand.u32 1, %s1921_s14  }
  0x16   : > { %s1676_s7 = smul.u32 112, %s1925_s15  ;;  %p2030_p9 = pnand %p1721_p3, %p37_p5 }
  0x17   : > { %s1697_s8 = smul.u32 112, %s152_s6  ;;  %s153_s24 = scalar_lea.sflag [#allocation3], %s152_s6 }
  0x18   : > { %s162_s11 = scalar_lea.hbm %s2991_s0, %s1676_s7  ;;  %p1829_p10 = pneg %p2030_p9 }
  0x19   : > { %s163_s20 = sshll.u32 %s162_s11, 4  ;;  %s156_s21 = scalar_lea.vmem [#allocation2], %s1697_s8  ;;  %s164_s20 = int_to_ptr.hbm [resolvable:$true] %s163_s20 }
  0x1a   : > { %s165_s22 = sshll.u32 %s156_s21, 4  ;;  %s1825_s25 = sshra.s32 %s164_s20, 4  ;;  %s166_s22 = int_to_ptr.vmem [resolvable:$true] %s165_s22  ;;  %s1826_s25 = int_to_ptr.hbm [resolvable:$true] %s1825_s25 }
  0x1b   : > { %s1827_s27 = scalar_lea.hbm %s1826_s25, 112  ;;  %s1832_s30 = scalar_lea.hbm %s2991_s0, 224 }
  0x1c   : > { %p1828_p2 = scmp.ne.s32.totalorder %s1826_s25, %s1827_s27  ;;  %p1833_p0 = scmp.lt.s32.totalorder %s1826_s25, %s2991_s0 }
  0x1d   : > { %p1834_p3 = scmp.lt.s32.totalorder %s1832_s30, %s1827_s27 }
  0x1e   : > { %p1830_p12 = pnand %p1829_p10, %p1828_p2 }
  0x1f   : > { %p1835_p5 = por %p1834_p3, %p1833_p0 }
  0x20   : > { %p1831_p13 = pneg %p1830_p12 }
  0x22   : > { %p1836_p11 = pnand %p1835_p5, %p1831_p13 }
  0x24   : > { %1839 = shalt.err (!%p1836_p11)
}
  0x25   : > { %s1930_s6 = smov 128   ;;  %s1931_s8 = smov 8  }
  0x26   : > { %1715 = dma.hbm_to_vmem [thread:$0]  (!%p2030_p9), %s164_s20, 1792, %s166_s22, %s153_s24, %s1930_s6, %s1930_s6, %s1931_s8  }
  0x27   : > { %177 = sbr.rel (%p1997_p8) target bundleno = 681 (0x2a9), region = 28  ;;  %s2047_s10 = sand.u32 (!%p1997_p8), 1, %s1917_s13  }
  0x28   : > { %s1698_s11 = smul.u32 (!%p1997_p8), 112, %s2047_s10  ;;  %s180_s21 = scalar_lea.sflag (!%p1997_p8), [#allocation3], %s2047_s10 }
  0x2a   : > { %s2051_s25 = scalar_lea.vmem (!%p1997_p8), [#allocation2], %s1698_s11 }
  0x2c   : > { %1900 = dma.done.wait (%p1984_p4), %s180_s21, 1792  }
  0x2d   : > { %1902 = vsyncadd (%p1984_p4), %s180_s21, 4294965504 }
  0x2e   : > { %1904 = dma.done.wait (%p42_p1), [#allocation6], 2048  }
  0x2f   : > { %1906 = vsyncadd (%p42_p1), [#allocation6], 4294965248  ;;  %v1642_v0 = vld [vmem:[#allocation5 + $0x38] sm:$0xff]  ;;  %v1641_v2 = vld [vmem:[#allocation5 + $0x30] sm:$0xff]  ;;  %vm750_vm0 = vcmask 1040384   ;;  %s2311_s18 = sshll.u32 %s1975_s16, 1 }
  0x30   : > { %v1650_v1 = vld [vmem:[#allocation5 + $0x78] sm:$0xff]  ;;  %439 = vmatpush.bf16.msra.mxu0 %v1642_v0  ;;  %1681 = vmatpush.bf16.msra.mxu2 %v1642_v0  ;;  %v1649_v3 = vld [vmem:[#allocation5 + $0x70] sm:$0xff]  ;;  %v1640_v4 = vld [vmem:[#allocation5 + $0x28] sm:$0xff]  ;;  %p220_p1 = scmp.lt.s32.totalorder %s2311_s18, 3  ;;  %s1483_s24 = sshll.u32 %s2047_s10, 1 }
  0x31   : > { %483 = vmatpush.bf16.msra.mxu1 %v1650_v1  ;;  %1689 = vmatpush.bf16.msra.mxu3 %v1650_v1  ;;  %v1648_v5 = vld [vmem:[#allocation5 + $0x68] sm:$0xff]  ;;  %v1639_v6 = vld [vmem:[#allocation5 + $0x20] sm:$0xff]  ;;  %v1638_v8 = vld [vmem:[#allocation5 + $0x18] sm:$0xff]  ;;  %s217_s27 = scalar_lea.vmem [#allocation7], %s1483_s24  ;;  %s1362_s30 = scalar_lea.hbm %s2994_s3, %s2311_s18 }
  0x32   : > { %v1647_v7 = vld [vmem:[#allocation5 + $0x60] sm:$0xff]  ;;  %v1646_v9 = vld [vmem:[#allocation5 + $0x58] sm:$0xff]  ;;  %v1637_v10 = vld [vmem:[#allocation5 + $0x10] sm:$0xff]  ;;  %s2361_s16 = scalar_select %p220_p1, %s2311_s18, 3 }
  0x33   : > { %v1645_v11 = vld [vmem:[#allocation5 + $0x50] sm:$0xff]  ;;  %v1636_v12 = vld [vmem:[#allocation5 + $0x8] sm:$0xff]  ;;  %v1635_v14 = vld [vmem:[#allocation5] sm:$0xff]  ;;  %s1363_s7 = sshll.u32 %s217_s27, 4  ;;  %s2959_s9 = sshll.u32 %s1362_s30, 4  ;;  %s1364_s7 = int_to_ptr.vmem [resolvable:$true] %s1363_s7  ;;  %s1366_s9 = int_to_ptr.hbm [resolvable:$true] %s2959_s9 }
  0x34   : > { %440 = vmatpush.bf16.msra.mxu0 %v1641_v2  ;;  %1682 = vmatpush.bf16.msra.mxu2 %v1641_v2  ;;  %v1644_v13 = vld [vmem:[#allocation5 + $0x48] sm:$0xff]  ;;  %v1643_v15 = vld [vmem:[#allocation5 + $0x40] sm:$0xff]  ;;  %s1699_s23 = smul.u32 28, %s2361_s16  ;;  %s1348_s6 = scalar_lea.sflag [#allocation4], %s2047_s10 }
  0x35   : > { %484 = vmatpush.bf16.msra.mxu1 %v1649_v3  ;;  %1690 = vmatpush.bf16.msra.mxu3 %v1649_v3  ;;  %v1488_v16 = vld [vmem:[%s2051_s25] sm:$0xf]  ;;  %v1622_v17 = vld [vmem:[%s2051_s25 + $0x4] sm:$0xf0]  ;;  %v1512_v18 = vld [vmem:[%s2051_s25 + $0x30] sm:$0xf] }
  0x36   : > { %v1628_v19 = vld [vmem:[%s2051_s25 + $0x34] sm:$0xf0]  ;;  %v1621_v20 = vld [vmem:[%s2051_s25 + $0x4] sm:$0xf]  ;;  %v1490_v21 = vld [vmem:[%s2051_s25 + $0x8] sm:$0xf0]  ;;  %v1489_v24 = vor.u32 %v1622_v17, %v1488_v16  ;;  %s2409_s22 = scalar_lea.vmem %s2993_s2, %s1699_s23 }
  0x37   : > { %v1629_v22 = vld [vmem:[%s2051_s25 + $0x44] sm:$0xf]  ;;  %v1522_v23 = vld [vmem:[%s2051_s25 + $0x48] sm:$0xf0]  ;;  %v1513_v25 = vor.u32 %v1628_v19, %v1512_v18  ;;  %v1493_v26 = vor.u32 %v1621_v20, %v1490_v21  ;;  %v1496_v28 = vld [vmem:[%s2051_s25 + $0x10] sm:$0xf] }
  0x38   : > { %441 = vmatpush.bf16.msra.mxu0 %v1640_v4  ;;  %1683 = vmatpush.bf16.msra.mxu2 %v1640_v4  ;;  %v1525_v27 = vor.u32 %v1629_v22, %v1522_v23  ;;  %v1624_v29 = vld [vmem:[%s2051_s25 + $0x14] sm:$0xf0]  ;;  %v1520_v30 = vld [vmem:[%s2051_s25 + $0x40] sm:$0xf]  ;;  %v1630_v31 = vld [vmem:[%s2051_s25 + $0x44] sm:$0xf0] }
  0x39   : > { %485 = vmatpush.bf16.msra.mxu1 %v1648_v5  ;;  %1691 = vmatpush.bf16.msra.mxu3 %v1648_v5  ;;  %v1623_v32 = vld [vmem:[%s2051_s25 + $0x14] sm:$0xf]  ;;  %v1498_v33 = vld [vmem:[%s2051_s25 + $0x18] sm:$0xf0]  ;;  %v1497_v36 = vor.u32 %v1624_v29, %v1496_v28  ;;  %v1521_v37 = vor.u32 %v1630_v31, %v1520_v30  ;;  %v1504_v40 = vld [vmem:[%s2051_s25 + $0x20] sm:$0xf] }
  0x3a   : > { %v1631_v34 = vld [vmem:[%s2051_s25 + $0x54] sm:$0xf]  ;;  %v1530_v35 = vld [vmem:[%s2051_s25 + $0x58] sm:$0xf0]  ;;  %v1501_v38 = vor.u32 %v1623_v32, %v1498_v33  ;;  %v1626_v41 = vld [vmem:[%s2051_s25 + $0x24] sm:$0xf0] }
  0x3b   : > { %v1533_v39 = vor.u32 %v1631_v34, %v1530_v35  ;;  %v1528_v42 = vld [vmem:[%s2051_s25 + $0x50] sm:$0xf]  ;;  %v1632_v43 = vld [vmem:[%s2051_s25 + $0x54] sm:$0xf0]  ;;  %v1625_v44 = vld [vmem:[%s2051_s25 + $0x24] sm:$0xf]  ;;  %v1505_v48 = vor.u32 %v1626_v41, %v1504_v40 }
  0x3c   : > { %442 = vmatpush.bf16.msra.mxu0 %v1639_v6  ;;  %1684 = vmatpush.bf16.msra.mxu2 %v1639_v6  ;;  %v1506_v45 = vld [vmem:[%s2051_s25 + $0x28] sm:$0xf0]  ;;  %v1633_v46 = vld [vmem:[%s2051_s25 + $0x64] sm:$0xf]  ;;  %v1529_v49 = vor.u32 %v1632_v43, %v1528_v42  ;;  %v1536_v52 = vld [vmem:[%s2051_s25 + $0x60] sm:$0xf] }
  0x3d   : > { %486 = vmatpush.bf16.msra.mxu1 %v1647_v7  ;;  %1692 = vmatpush.bf16.msra.mxu3 %v1647_v7  ;;  %v1538_v47 = vld [vmem:[%s2051_s25 + $0x68] sm:$0xf0]  ;;  %v1509_v50 = vor.u32 %v1625_v44, %v1506_v45  ;;  %v1634_v53 = vld [vmem:[%s2051_s25 + $0x64] sm:$0xf0]  ;;  %v1627_v54 = vld [vmem:[%s2051_s25 + $0x34] sm:$0xf] }
  0x3e   : > { %v1541_v51 = vor.u32 %v1633_v46, %v1538_v47  ;;  %v1514_v55 = vld [vmem:[%s2051_s25 + $0x38] sm:$0xf0]  ;;  %v1537_v56 = vor.u32 %v1634_v53, %v1536_v52  ;;  %s1869_s8 = sshra.s32 %s1366_s9, 4  ;;  %s1875_s18 = scalar_lea.hbm %s2994_s3, 4  ;;  %s1870_s8 = int_to_ptr.hbm [resolvable:$true] %s1869_s8 }
  0x3f   : > { %v1517_v57 = vor.u32 %v1627_v54, %v1514_v55  ;;  %s1871_s11 = scalar_lea.hbm %s1870_s8, 2  ;;  %p1876_p9 = scmp.lt.s32.totalorder %s1870_s8, %s2994_s3 }
  0x40   : > { %443 = vmatpush.bf16.msra.mxu0 %v1638_v8  ;;  %1685 = vmatpush.bf16.msra.mxu2 %v1638_v8  ;;  %p1872_p4 = scmp.ne.s32.totalorder %s1870_s8, %s1871_s11  ;;  %p1877_p2 = scmp.lt.s32.totalorder %s1875_s18, %s1871_s11 }
  0x41   : > { %487 = vmatpush.bf16.msra.mxu1 %v1646_v9  ;;  %1693 = vmatpush.bf16.msra.mxu3 %v1646_v9 }
  0x42   : > { %p1873_p8 = pnand %p1872_p4, %p2021_p7  ;;  %p1878_p10 = por %p1877_p2, %p1876_p9 }
  0x44   : > { %444 = vmatpush.bf16.msra.mxu0 %v1637_v10  ;;  %1686 = vmatpush.bf16.msra.mxu2 %v1637_v10  ;;  %p1874_p11 = pneg %p1873_p8 }
  0x45   : > { %488 = vmatpush.bf16.msra.mxu1 %v1645_v11  ;;  %1694 = vmatpush.bf16.msra.mxu3 %v1645_v11 }
  0x46   : > { %p1879_p12 = pnand %p1878_p10, %p1874_p11 }
  0x48   : > { %445 = vmatpush.bf16.msra.mxu0 %v1636_v12  ;;  %1687 = vmatpush.bf16.msra.mxu2 %v1636_v12 }
  0x49   : > { %489 = vmatpush.bf16.msra.mxu1 %v1644_v13  ;;  %1695 = vmatpush.bf16.msra.mxu3 %v1644_v13 }
  0x4c   : > { %446 = vmatpush.bf16.msra.mxu0 %v1635_v14  ;;  %1688 = vmatpush.bf16.msra.mxu2 %v1635_v14 }
  0x4d   : > { %490 = vmatpush.bf16.msra.mxu1 %v1643_v15  ;;  %1696 = vmatpush.bf16.msra.mxu3 %v1643_v15 }
  0x4f   : > { %447 = vmatmul.bf16.vlgmr.msra.gmra.mxu0 %v1489_v24  ;;  %462 = vmatmul.bf16.vlgmr.msra.gmra.mxu2 %v1513_v25 }
  0x50   : > { %491 = vmatmul.bf16.vlgmr.msra.gmra.mxu1 %v1493_v26  ;;  %511 = vmatmul.bf16.vlgmr.msra.gmra.mxu3 %v1525_v27 }
  0x5f   : > { %452 = vmatmul.bf16.gmra.mxu0 %v1497_v36  ;;  %467 = vmatmul.bf16.gmra.mxu2 %v1521_v37 }
  0x60   : > { %496 = vmatmul.bf16.gmra.mxu1 %v1501_v38  ;;  %516 = vmatmul.bf16.gmra.mxu3 %v1533_v39 }
  0x6f   : > { %457 = vmatmul.bf16.gmra.mxu0 %v1505_v48  ;;  %472 = vmatmul.bf16.gmra.mxu2 %v1529_v49 }
  0x70   : > { %501 = vmatmul.bf16.gmra.mxu1 %v1509_v50  ;;  %521 = vmatmul.bf16.gmra.mxu3 %v1541_v51 }
  0x7f   : > { %477 = vmatmul.bf16.gmra.mxu2 %v1537_v56 }
  0x80   : > { %506 = vmatmul.bf16.gmra.mxu1 %v1517_v57 }
  0xcc   : > { %v448_v58 = vpop.f32.mrf.mxu0 }
  0xcd   : > { %v492_v59 = vpop.f32.mrf.mxu1 }
  0xce   : > { %v2089_v60 = vadd.f32 %v492_v59, %v448_v58 }
  0xd0   : > { %v527_v61 = vmul.f32 %v2089_v60, %v2089_v60 }
  0xd2   : > { %541 = vadd.xlane.f32.xlu0 %v527_v61  ;;  %v463_v62 = vpop.f32.mrf.mxu2 }
  0xd3   : > { %v512_v3 = vpop.f32.mrf.mxu3 }
  0xd4   : > { %v450_v63 = vpop.f32.mrf.mxu0 }
  0xd5   : > { %v494_v0 = vpop.f32.mrf.mxu1 }
  0xd6   : > { %v2093_v1 = vadd.f32 %v494_v0, %v450_v63 }
  0xd8   : > { %v528_v2 = vmul.f32 %v2093_v1, %v2093_v1 }
  0xda   : > { %543 = vadd.xlane.f32.xlu1 %v528_v2  ;;  %v465_v4 = vpop.f32.mrf.mxu2 }
  0xdb   : > { %v514_v10 = vpop.f32.mrf.mxu3 }
  0xdc   : > { %v453_v5 = vpop.f32.mrf.mxu0 }
  0xdd   : > { %v497_v6 = vpop.f32.mrf.mxu1 }
  0xde   : > { %v2097_v7 = vadd.f32 %v497_v6, %v453_v5 }
  0xe0   : > { %v529_v8 = vmul.f32 %v2097_v7, %v2097_v7 }
  0xe2   : > { %545 = vadd.xlane.f32.xlu1 %v529_v8  ;;  %v468_v9 = vpop.f32.mrf.mxu2 }
  0xe3   : > { %v2101_v11 = vadd.f32 %v512_v3, %v468_v9  ;;  %v517_v19 = vpop.f32.mrf.mxu3 }
  0xe4   : > { %v455_v12 = vpop.f32.mrf.mxu0 }
  0xe5   : > { %v499_v13 = vpop.f32.mrf.mxu1  ;;  %v535_v14 = vmul.f32 %v2101_v11, %v2101_v11 }
  0xe6   : > { %v2105_v15 = vadd.f32 %v499_v13, %v455_v12 }
  0xe7   : > { %557 = vadd.xlane.f32.xlu0 %v535_v14 }
  0xe8   : > { %v530_v16 = vmul.f32 %v2105_v15, %v2105_v15 }
  0xea   : > { %547 = vadd.xlane.f32.xlu2 %v530_v16  ;;  %v470_v17 = vpop.f32.mrf.mxu2 }
  0xeb   : > { %v2109_v18 = vadd.f32 %v514_v10, %v470_v17  ;;  %v519_v29 = vpop.f32.mrf.mxu3 }
  0xec   : > { %v458_v20 = vpop.f32.mrf.mxu0 }
  0xed   : > { %v502_v21 = vpop.f32.mrf.mxu1  ;;  %v536_v22 = vmul.f32 %v2109_v18, %v2109_v18 }
  0xee   : > { %v2113_v23 = vadd.f32 %v502_v21, %v458_v20 }
  0xef   : > { %559 = vadd.xlane.f32.xlu1 %v536_v22 }
  0xf0   : > { %v531_v24 = vmul.f32 %v2113_v23, %v2113_v23  ;;  %v756_v40 = vmax.f32 %v2089_v60, %v2113_v23 }
  0xf2   : > { %549 = vadd.xlane.f32.xlu2 %v531_v24  ;;  %v473_v25 = vpop.f32.mrf.mxu2 }
  0xf3   : > { %v2117_v26 = vadd.f32 %v517_v19, %v473_v25  ;;  %v522_v37 = vpop.f32.mrf.mxu3 }
  0xf4   : > { %v460_v27 = vpop.f32.mrf.mxu0 }
  0xf5   : > { %v504_v28 = vpop.f32.mrf.mxu1  ;;  %v537_v31 = vmul.f32 %v2117_v26, %v2117_v26 }
  0xf6   : > { %v2119_v30 = vadd.f32 %v504_v28, %v460_v27 }
  0xf8   : > { %v532_v32 = vmul.f32 %v2119_v30, %v2119_v30  ;;  %v757_v36 = vmax.f32 %v2093_v1, %v2119_v30 }
  0xfa   : > { %561 = vadd.xlane.f32.xlu2 %v537_v31  ;;  %551 = vadd.xlane.f32.xlu0 %v532_v32  ;;  %v475_v33 = vpop.f32.mrf.mxu2  ;;  %v761_v43 = vmax.f32 %v756_v40, %v757_v36 }
  0xfb   : > { %v2137_v45 = vadd.f32 %v519_v29, %v475_v33  ;;  %v524_v54 = vpop.f32.mrf.mxu3 }
  0xfd   : > { %v507_v34 = vpop.f32.mrf.mxu1  ;;  %v538_v51 = vmul.f32 %v2137_v45, %v2137_v45 }
  0xfe   : > { %v2125_v35 = vadd.f32 %v507_v34, %v463_v62 }
 0x100   : > { %v759_v38 = vsel %vm750_vm0, %v2125_v35, -inf  ;;  %v533_v39 = vmul.f32 %v2125_v35, %v2125_v35 }
 0x101   : > { %v760_v41 = vmax.f32 %v2097_v7, %v759_v38 }
 0x102   : > { %553 = vadd.xlane.f32.xlu0 %v533_v39  ;;  %v478_v42 = vpop.f32.mrf.mxu2 }
 0x103   : > { %v762_v44 = vmax.f32 %v760_v41, %v2105_v15  ;;  %v2145_v53 = vadd.f32 %v522_v37, %v478_v42 }
 0x105   : > { %v763_v46 = vmax.f32 %v761_v43, %v762_v44  ;;  %v509_v47 = vpop.f32.mrf.mxu1  ;;  %v1058_v63 = vmax.f32 %v2101_v11, %v2145_v53  ;;  %v539_v8 = vmul.f32 %v2145_v53, %v2145_v53 }
 0x106   : > { %v2139_v48 = vadd.f32 %v509_v47, %v465_v4 }
 0x107   : > { %v764_v49 = vrot.slane %v763_v46, 4 }
 0x108   : > { %v534_v50 = vmul.f32 %v2139_v48, %v2139_v48  ;;  %v1057_v58 = vmax.f32 %v2139_v48, %v2137_v45 }
 0x109   : > { %v765_v52 = vmax.f32 %v763_v46, %v764_v49 }
 0x10a   : > { %555 = vadd.xlane.f32.xlu2 %v534_v50  ;;  %563 = vadd.xlane.f32.xlu0 %v538_v51  ;;  %v480_v55 = vpop.f32.mrf.mxu2  ;;  %v1061_v3 = vmax.f32 %v1057_v58, %v1058_v63 }
 0x10b   : > { %v766_v56 = vrot.slane %v765_v52, 2  ;;  %v2147_v57 = vadd.f32 %v524_v54, %v480_v55 }
 0x10d   : > { %v767_v59 = vmax.f32 %v765_v52, %v766_v56  ;;  %v1059_v61 = vsel %vm750_vm0, %v2147_v57, -inf  ;;  %v540_v62 = vmul.f32 %v2147_v57, %v2147_v57 }
 0x10e   : > { %v1060_v0 = vmax.f32 %v2109_v18, %v1059_v61 }
 0x10f   : > { %v768_v2 = vrot.slane %v767_v59, 1  ;;  %567 = vadd.xlane.f32.xlu1 %v540_v62 }
 0x110   : > { %v1062_v4 = vmax.f32 %v1060_v0, %v2117_v26 }
 0x111   : > { %v2159_v5 = vmax.f32 %v767_v59, %v768_v2 }
 0x112   : > { %v1063_v6 = vmax.f32 %v1061_v3, %v1062_v4 }
 0x113   : > { %vm771_vm1 = vcmp.eq.f32.partialorder %v2089_v60, %v2159_v5  ;;  %vm772_vm2 = vcmp.eq.f32.partialorder %v2093_v1, %v2159_v5  ;;  %vm773_vm3 = vcmp.eq.f32.partialorder %v2097_v7, %v2159_v5  ;;  %vm775_vm4 = vcmp.eq.f32.partialorder %v2113_v23, %v2159_v5 }
 0x114   : > { %vm776_vm5 = vcmp.eq.f32.partialorder %v2119_v30, %v2159_v5  ;;  %vm777_vm6 = vcmp.eq.f32.partialorder %v2125_v35, %v2159_v5  ;;  %v778_v9 = vsel %vm771_vm1, -inf, %v2089_v60  ;;  %vm774_vm7 = vcmp.eq.f32.partialorder %v2105_v15, %v2159_v5 }
 0x115   : > { %v779_v10 = vsel %vm772_vm2, -inf, %v2093_v1  ;;  %v780_v12 = vsel %vm773_vm3, -inf, %v2097_v7  ;;  %v782_v13 = vsel %vm775_vm4, -inf, %v2113_v23  ;;  %v783_v14 = vsel %vm776_vm5, -inf, %v2119_v30 }
 0x116   : > { %v784_v16 = vsel %vm777_vm6, -inf, %v2125_v35  ;;  %v785_v17 = vmax.f32 %v778_v9, %v782_v13  ;;  %v1064_v19 = vrot.slane %v1063_v6, 4  ;;  %v786_v20 = vmax.f32 %v779_v10, %v783_v14 }
 0x117   : > { %v787_v21 = vsel %vm750_vm0, %v784_v16, -inf  ;;  %565 = vadd.xlane.f32.xlu1 %v539_v8  ;;  %v781_v25 = vsel %vm774_vm7, -inf, %v2105_v15 }
 0x118   : > { %v788_v22 = vmax.f32 %v780_v12, %v787_v21  ;;  %v1065_v24 = vmax.f32 %v1063_v6, %v1064_v19  ;;  %v789_v27 = vmax.f32 %v785_v17, %v786_v20 }
 0x11a   : > { %v790_v28 = vmax.f32 %v788_v22, %v781_v25  ;;  %v1066_v29 = vrot.slane %v1065_v24, 2 }
 0x11c   : > { %v791_v31 = vmax.f32 %v789_v27, %v790_v28  ;;  %v1067_v32 = vmax.f32 %v1065_v24, %v1066_v29 }
 0x11e   : > { %v792_v33 = vrot.slane %v791_v31, 4  ;;  %v1068_v34 = vrot.slane %v1067_v32, 1 }
 0x120   : > { %v793_v36 = vmax.f32 %v791_v31, %v792_v33  ;;  %v2185_v37 = vmax.f32 %v1067_v32, %v1068_v34 }
 0x122   : > { %v794_v38 = vrot.slane %v793_v36, 2  ;;  %vm1071_vm8 = vcmp.eq.f32.partialorder %v2139_v48, %v2185_v37  ;;  %vm1072_vm9 = vcmp.eq.f32.partialorder %v2101_v11, %v2185_v37  ;;  %vm1073_vm10 = vcmp.eq.f32.partialorder %v2109_v18, %v2185_v37 }
 0x123   : > { %vm1075_vm11 = vcmp.eq.f32.partialorder %v2137_v45, %v2185_v37  ;;  %vm1076_vm12 = vcmp.eq.f32.partialorder %v2145_v53, %v2185_v37  ;;  %vm1077_vm13 = vcmp.eq.f32.partialorder %v2147_v57, %v2185_v37  ;;  %v1078_v40 = vsel %vm1071_vm8, -inf, %v2139_v48 }
 0x124   : > { %v795_v39 = vmax.f32 %v793_v36, %v794_v38  ;;  %v1079_v41 = vsel %vm1072_vm9, -inf, %v2101_v11  ;;  %v1080_v42 = vsel %vm1073_vm10, -inf, %v2109_v18  ;;  %vm1074_vm14 = vcmp.eq.f32.partialorder %v2117_v26, %v2185_v37 }
 0x125   : > { %v1082_v43 = vsel %vm1075_vm11, -inf, %v2137_v45  ;;  %v1083_v44 = vsel %vm1076_vm12, -inf, %v2145_v53  ;;  %v1084_v46 = vsel %vm1077_vm13, -inf, %v2147_v57  ;;  %v1081_v55 = vsel %vm1074_vm14, -inf, %v2117_v26 }
 0x126   : > { %v796_v47 = vrot.slane %v795_v39, 1  ;;  %v1085_v49 = vmax.f32 %v1078_v40, %v1082_v43  ;;  %v1086_v50 = vmax.f32 %v1079_v41, %v1083_v44  ;;  %v1087_v51 = vsel %vm750_vm0, %v1084_v46, -inf }
 0x127   : > { %v1088_v52 = vmax.f32 %v1080_v42, %v1087_v51 }
 0x128   : > { %v797_v54 = vmax.f32 %v795_v39, %v796_v47  ;;  %v1089_v56 = vmax.f32 %v1085_v49, %v1086_v50 }
 0x129   : > { %v1090_v58 = vmax.f32 %v1088_v52, %v1081_v55 }
 0x12a   : > { %vm799_vm15 = vcmp.eq.f32.partialorder %v778_v9, %v797_v54  ;;  %vm800_vm1 = vcmp.eq.f32.partialorder %v779_v10, %v797_v54  ;;  %vm801_vm2 = vcmp.eq.f32.partialorder %v780_v12, %v797_v54  ;;  %vm803_vm3 = vcmp.eq.f32.partialorder %v782_v13, %v797_v54 }
 0x12b   : > { %vm804_vm4 = vcmp.eq.f32.partialorder %v783_v14, %v797_v54  ;;  %vm805_vm5 = vcmp.eq.f32.partialorder %v784_v16, %v797_v54  ;;  %v806_v59 = vsel %vm799_vm15, -inf, %v778_v9  ;;  %vm802_vm6 = vcmp.eq.f32.partialorder %v781_v25, %v797_v54 }
 0x12c   : > { %v807_v61 = vsel %vm800_vm1, -inf, %v779_v10  ;;  %v808_v62 = vsel %vm801_vm2, -inf, %v780_v12  ;;  %v810_v63 = vsel %vm803_vm3, -inf, %v782_v13  ;;  %v811_v0 = vsel %vm804_vm4, -inf, %v783_v14 }
 0x12d   : > { %v812_v2 = vsel %vm805_vm5, -inf, %v784_v16  ;;  %v813_v3 = vmax.f32 %v806_v59, %v810_v63  ;;  %v1091_v4 = vmax.f32 %v1089_v56, %v1090_v58  ;;  %v814_v6 = vmax.f32 %v807_v61, %v811_v0 }
 0x12e   : > { %v815_v8 = vsel %vm750_vm0, %v812_v2, -inf  ;;  %v798_v17 = vadd.f32 %v797_v54, %v2159_v5  ;;  %v809_v21 = vsel %vm802_vm6, -inf, %v781_v25 }
 0x12f   : > { %v816_v19 = vmax.f32 %v808_v62, %v815_v8  ;;  %v1092_v20 = vrot.slane %v1091_v4, 4  ;;  %v817_v22 = vmax.f32 %v813_v3, %v814_v6 }
 0x131   : > { %v818_v24 = vmax.f32 %v816_v19, %v809_v21  ;;  %v1093_v27 = vmax.f32 %v1091_v4, %v1092_v20 }
 0x133   : > { %v819_v9 = vmax.f32 %v817_v22, %v818_v24  ;;  %v1094_v28 = vrot.slane %v1093_v27, 2 }
 0x135   : > { %v820_v10 = vrot.slane %v819_v9, 4  ;;  %v1095_v12 = vmax.f32 %v1093_v27, %v1094_v28 }
 0x137   : > { %v821_v13 = vmax.f32 %v819_v9, %v820_v10  ;;  %v1096_v14 = vrot.slane %v1095_v12, 1 }
 0x139   : > { %v822_v16 = vrot.slane %v821_v13, 2  ;;  %v1097_v29 = vmax.f32 %v1095_v12, %v1096_v14 }
 0x13b   : > { %v823_v31 = vmax.f32 %v821_v13, %v822_v16  ;;  %vm1099_vm7 = vcmp.eq.f32.partialorder %v1078_v40, %v1097_v29  ;;  %vm1100_vm8 = vcmp.eq.f32.partialorder %v1079_v41, %v1097_v29  ;;  %vm1101_vm9 = vcmp.eq.f32.partialorder %v1080_v42, %v1097_v29 }
 0x13c   : > { %vm1103_vm10 = vcmp.eq.f32.partialorder %v1082_v43, %v1097_v29  ;;  %vm1104_vm11 = vcmp.eq.f32.partialorder %v1083_v44, %v1097_v29  ;;  %vm1105_vm12 = vcmp.eq.f32.partialorder %v1084_v46, %v1097_v29  ;;  %vm1102_vm13 = vcmp.eq.f32.partialorder %v1081_v55, %v1097_v29 }
 0x13d   : > { %v824_v5 = vrot.slane %v823_v31, 1  ;;  %v2211_v25 = vsel %vm1099_vm7, -inf, %v1078_v40  ;;  %v2213_v32 = vsel %vm1100_vm8, -inf, %v1079_v41  ;;  %v2215_v33 = vsel %vm1101_vm9, -inf, %v1080_v42 }
 0x13e   : > { %v2217_v34 = vsel %vm1103_vm10, -inf, %v1082_v43  ;;  %v2219_v36 = vsel %vm1104_vm11, -inf, %v1083_v44  ;;  %v2221_v38 = vsel %vm1105_vm12, -inf, %v1084_v46  ;;  %v2225_v49 = vsel %vm1102_vm13, -inf, %v1081_v55 }
 0x13f   : > { %v825_v39 = vmax.f32 %v823_v31, %v824_v5  ;;  %v1115_v47 = vsel %vm750_vm0, %v2221_v38, -inf  ;;  %v1113_v40 = vmax.f32 %v2211_v25, %v2217_v34  ;;  %v1114_v41 = vmax.f32 %v2213_v32, %v2219_v36 }
 0x140   : > { %v1116_v42 = vmax.f32 %v2215_v33, %v1115_v47 }
 0x141   : > { %vm827_vm14 = vcmp.eq.f32.partialorder %v806_v59, %v825_v39  ;;  %vm828_vm15 = vcmp.eq.f32.partialorder %v807_v61, %v825_v39  ;;  %vm829_vm1 = vcmp.eq.f32.partialorder %v808_v62, %v825_v39  ;;  %vm831_vm2 = vcmp.eq.f32.partialorder %v810_v63, %v825_v39 }
 0x142   : > { %vm832_vm3 = vcmp.eq.f32.partialorder %v811_v0, %v825_v39  ;;  %vm833_vm4 = vcmp.eq.f32.partialorder %v812_v2, %v825_v39  ;;  %v834_v43 = vsel %vm827_vm14, -inf, %v806_v59  ;;  %vm830_vm5 = vcmp.eq.f32.partialorder %v809_v21, %v825_v39 }
 0x143   : > { %v835_v44 = vsel %vm828_vm15, -inf, %v807_v61  ;;  %v836_v46 = vsel %vm829_vm1, -inf, %v808_v62  ;;  %v838_v50 = vsel %vm831_vm2, -inf, %v810_v63  ;;  %v839_v51 = vsel %vm832_vm3, -inf, %v811_v0 }
 0x144   : > { %v840_v52 = vsel %vm833_vm4, -inf, %v812_v2  ;;  %v841_v54 = vmax.f32 %v834_v43, %v838_v50  ;;  %v1117_v55 = vmax.f32 %v1113_v40, %v1114_v41  ;;  %v842_v56 = vmax.f32 %v835_v44, %v839_v51 }
 0x145   : > { %v843_v58 = vsel %vm750_vm0, %v840_v52, -inf  ;;  %v1118_v3 = vmax.f32 %v1116_v42, %v2225_v49  ;;  %v542_v4 = vpop.xlane.xlu0 %541  ;;  %v2234_v6 = vadd.f32 %v825_v39, %v798_v17  ;;  %v2239_v59 = vadd.f32 %v1097_v29, %v2185_v37 }
 0x146   : > { %v844_v8 = vmax.f32 %v836_v46, %v843_v58  ;;  %v2236_v19 = vmax.f32 %v542_v4, 1e-24  ;;  %v837_v61 = vsel %vm830_vm5, -inf, %v809_v21  ;;  %v845_v62 = vmax.f32 %v841_v54, %v842_v56 }
 0x147   : > { %v1119_v63 = vmax.f32 %v1117_v55, %v1118_v3 }
 0x148   : > { %v846_v0 = vmax.f32 %v844_v8, %v837_v61  ;;  %1763 = vrsqrt.f32 %v2236_v19  ;;  %vm589_vm5 = vweird.f32 %v2236_v19 }
 0x149   : > { %v1120_v2 = vrot.slane %v1119_v63, 4 }
 0x14a   : > { %v847_v20 = vmax.f32 %v845_v62, %v846_v0 }
 0x14b   : > { %v1121_v22 = vmax.f32 %v1119_v63, %v1120_v2 }
 0x14c   : > { %v848_v24 = vrot.slane %v847_v20, 4 }
 0x14d   : > { %v1122_v27 = vrot.slane %v1121_v22, 2  ;;  %v544_v17 = vpop.xlane.xlu1 %543 }
 0x14e   : > { %v2243_v9 = vpop.eup %1763  ;;  %v849_v28 = vmax.f32 %v847_v20, %v848_v24  ;;  %v2247_v21 = vmax.f32 %v544_v17, 1e-24 }
 0x14f   : > { %v1123_v10 = vmax.f32 %v1121_v22, %v1122_v27  ;;  %v584_v37 = vmul.f32 %v2243_v9, %v2236_v19 }
 0x150   : > { %v850_v12 = vrot.slane %v849_v28, 2  ;;  %1765 = vrsqrt.f32 %v2247_v21 }
 0x151   : > { %v1124_v13 = vrot.slane %v1123_v10, 1  ;;  %v585_v14 = vmul.f32 %v2243_v9, %v584_v37 }
 0x152   : > { %v851_v16 = vmax.f32 %v849_v28, %v850_v12 }
 0x153   : > { %v2250_v29 = vmax.f32 %v1123_v10, %v1124_v13  ;;  %v586_v5 = vmul.f32 0.5, %v585_v14 }
 0x154   : > { %v852_v31 = vrot.slane %v851_v16, 1 }
 0x155   : > { %vm1127_vm6 = vcmp.eq.f32.partialorder %v2211_v25, %v2250_v29  ;;  %vm1128_vm7 = vcmp.eq.f32.partialorder %v2213_v32, %v2250_v29  ;;  %vm1129_vm8 = vcmp.eq.f32.partialorder %v2215_v33, %v2250_v29  ;;  %vm1130_vm9 = vcmp.eq.f32.partialorder %v2225_v49, %v2250_v29  ;;  %v546_v56 = vpop.xlane.xlu1 %545 }
 0x156   : > { %v2259_v39 = vmax.f32 %v851_v16, %v852_v31  ;;  %vm1131_vm10 = vcmp.eq.f32.partialorder %v2217_v34, %v2250_v29  ;;  %vm1132_vm11 = vcmp.eq.f32.partialorder %v2219_v36, %v2250_v29  ;;  %vm1133_vm12 = vcmp.eq.f32.partialorder %v2221_v38, %v2250_v29 }
 0x157   : > { %v2270_v47 = vsel %vm1127_vm6, -inf, %v2211_v25  ;;  %v2273_v40 = vsel %vm1128_vm7, -inf, %v2213_v32  ;;  %v2276_v41 = vsel %vm1129_vm8, -inf, %v2215_v33  ;;  %v2288_v32 = vpop.eup %1765  ;;  %v587_v2 = vsub.f32 1.5, %v586_v5 }
 0x158   : > { %vm855_vm13 = vcmp.eq.f32.partialorder %v834_v43, %v2259_v39  ;;  %vm856_vm14 = vcmp.eq.f32.partialorder %v835_v44, %v2259_v39  ;;  %vm857_vm15 = vcmp.eq.f32.partialorder %v836_v46, %v2259_v39  ;;  %vm858_vm1 = vcmp.eq.f32.partialorder %v837_v61, %v2259_v39 }
 0x159   : > { %vm859_vm2 = vcmp.eq.f32.partialorder %v838_v50, %v2259_v39  ;;  %vm860_vm3 = vcmp.eq.f32.partialorder %v839_v51, %v2259_v39  ;;  %vm861_vm4 = vcmp.eq.f32.partialorder %v840_v52, %v2259_v39  ;;  %v2285_v25 = vsel %vm855_vm13, -inf, %v834_v43 }
 0x15a   : > { %v2290_v33 = vsel %vm856_vm14, -inf, %v835_v44  ;;  %v2292_v42 = vsel %vm857_vm15, -inf, %v836_v46  ;;  %v2294_v54 = vsel %vm858_vm1, -inf, %v837_v61  ;;  %v2296_v55 = vsel %vm859_vm2, -inf, %v838_v50  ;;  %v558_v62 = vpop.xlane.xlu0 %557 }
 0x15b   : > { %v2298_v58 = vsel %vm860_vm3, -inf, %v839_v51  ;;  %v2300_v3 = vsel %vm861_vm4, -inf, %v840_v52  ;;  %v869_v43 = vmax.f32 %v2285_v25, %v2296_v55  ;;  %v2308_v44 = vsel %vm1131_vm10, -inf, %v2217_v34 }
 0x15c   : > { %v870_v46 = vmax.f32 %v2290_v33, %v2298_v58  ;;  %v871_v50 = vsel %vm750_vm0, %v2300_v3, -inf  ;;  %v2321_v51 = vsel %vm1132_vm11, -inf, %v2219_v36  ;;  %v2327_v34 = vsel %vm1133_vm12, -inf, %v2221_v38 }
 0x15d   : > { %v872_v52 = vmax.f32 %v2292_v42, %v871_v50  ;;  %v1141_v4 = vmax.f32 %v2270_v47, %v2308_v44  ;;  %v1142_v8 = vmax.f32 %v2273_v40, %v2321_v51  ;;  %v1143_v61 = vsel %vm750_vm0, %v2327_v34, -inf  ;;  %v548_v36 = vpop.xlane.xlu2 %547 }
 0x15e   : > { %v873_v63 = vmax.f32 %v869_v43, %v870_v46  ;;  %v1144_v0 = vmax.f32 %v2276_v41, %v1143_v61  ;;  %v594_v38 = vmul.f32 %v2288_v32, %v2247_v21  ;;  %v2345_v22 = vsel %vm1130_vm9, -inf, %v2225_v49 }
 0x15f   : > { %v874_v20 = vmax.f32 %v872_v52, %v2294_v54  ;;  %v1145_v24 = vmax.f32 %v1141_v4, %v1142_v8  ;;  %v2347_v27 = vmax.f32 %v546_v56, 1e-24  ;;  %vm590_vm6 = vweird.f32 %v2243_v9 }
 0x160   : > { %v1146_v17 = vmax.f32 %v1144_v0, %v2345_v22  ;;  %v595_v28 = vmul.f32 %v2288_v32, %v594_v38  ;;  %v2352_v10 = vmax.f32 %v558_v62, 1e-24  ;;  %v588_v12 = vmul.f32 %v2243_v9, %v587_v2  ;;  %vm2369_vm7 = vmor %vm589_vm5, %vm590_vm6 }
 0x161   : > { %v875_v37 = vmax.f32 %v873_v63, %v874_v20  ;;  %1767 = vrsqrt.f32 %v2347_v27  ;;  %v2356_v13 = vmax.f32 %v548_v36, 1e-24  ;;  %vm600_vm8 = vweird.f32 %v2288_v32 }
 0x162   : > { %v1147_v49 = vmax.f32 %v1145_v24, %v1146_v17  ;;  %v596_v14 = vmul.f32 0.5, %v595_v28  ;;  %1769 = vrsqrt.f32 %v2352_v10  ;;  %v560_v16 = vpop.xlane.xlu1 %559  ;;  %v592_v52 = vsel %vm2369_vm7, %v2243_v9, %v588_v12 }
 0x163   : > { %v876_v31 = vrot.slane %v875_v37, 4  ;;  %1771 = vrsqrt.f32 %v2356_v13  ;;  %v2374_v46 = vmax.f32 %v560_v16, 1e-24  ;;  %v2381_v8 = vadd.f32 %v2259_v39, %v2234_v6 }
 0x164   : > { %v1148_v5 = vrot.slane %v1147_v49, 4  ;;  %v597_v43 = vsub.f32 1.5, %v596_v14  ;;  %v2385_v19 = vadd.f32 %v2250_v29, %v2239_v59  ;;  %vm599_vm9 = vweird.f32 %v2247_v21 }
 0x165   : > { %v877_v50 = vmax.f32 %v875_v37, %v876_v31  ;;  %v550_v4 = vpop.xlane.xlu2 %549  ;;  %1773 = vrsqrt.f32 %v2374_v46  ;;  %vm601_vm10 = vmor %vm599_vm9, %vm600_vm8  ;;  %v723_v39 = vmul.f32 %v592_v52, %v2089_v60  ;;  %vm609_vm11 = vweird.f32 %v2347_v27 }
 0x166   : > { %v1149_v61 = vmax.f32 %v1147_v49, %v1148_v5  ;;  %v598_v62 = vmul.f32 %v2288_v32, %v597_v43  ;;  %v2404_v20 = vmax.f32 %v550_v4, 1e-24  ;;  %vm669_vm13 = vweird.f32 %v2352_v10 }
 0x167   : > { %v2391_v36 = vpop.eup %1767  ;;  %v878_v9 = vrot.slane %v877_v50, 2  ;;  %vm679_vm5 = vweird.f32 %v2374_v46 }
 0x168   : > { %v2393_v63 = vpop.eup %1769  ;;  %v1150_v6 = vrot.slane %v1149_v61, 2  ;;  %v602_v59 = vsel %vm601_vm10, %v2288_v32, %v598_v62  ;;  %v604_v29 = vmul.f32 %v2391_v36, %v2347_v27  ;;  %1775 = vrsqrt.f32 %v2404_v20 }
 0x169   : > { %v2399_v0 = vpop.eup %1771  ;;  %v879_v2 = vmax.f32 %v877_v50, %v878_v9  ;;  %v724_v21 = vmul.f32 %v602_v59, %v2093_v1  ;;  %v664_v38 = vmul.f32 %v2393_v63, %v2352_v10  ;;  %vm610_vm12 = vweird.f32 %v2391_v36 }
 0x16a   : > { %v1151_v24 = vmax.f32 %v1149_v61, %v1150_v6  ;;  %v605_v60 = vmul.f32 %v2391_v36, %v604_v29  ;;  %v614_v32 = vmul.f32 %v2399_v0, %v2356_v13  ;;  %vm670_vm14 = vweird.f32 %v2393_v63 }
 0x16b   : > { %v880_v17 = vrot.slane %v879_v2, 1  ;;  %v1654_v28 = vpack.c.bf16 %v724_v21, %v723_v39  ;;  %v665_v1 = vmul.f32 %v2393_v63, %v664_v38  ;;  %v2415_v37 = vpop.eup %1773  ;;  %vm620_vm1 = vweird.f32 %v2399_v0 }
 0x16c   : > { %v1152_v12 = vrot.slane %v1151_v24, 1  ;;  %v606_v49 = vmul.f32 0.5, %v605_v60  ;;  %v615_v14 = vmul.f32 %v2399_v0, %v614_v32  ;;  %v674_v50 = vmul.f32 %v2415_v37, %v2374_v46 }
 0x16d   : > { %v2418_v16 = vmax.f32 %v879_v2, %v880_v17  ;;  %1655 = vst [vmem:[%s2409_s22] sm:$0xff] %v1654_v28   ;;  %v666_v31 = vmul.f32 0.5, %v665_v1  ;;  %v562_v5 = vpop.xlane.xlu2 %561  ;;  %v2423_v56 = vpop.xlane.xlu0 %551 }
 0x16e   : > { %v2425_v43 = vmax.f32 %v1151_v24, %v1152_v12  ;;  %v607_v52 = vsub.f32 1.5, %v606_v49  ;;  %v616_v4 = vmul.f32 0.5, %v615_v14  ;;  %v2441_v61 = vmax.f32 %v562_v5, 1e-24  ;;  %v2458_v39 = vpop.eup %1775 }
 0x16f   : > { %vm885_vm2 = vcmp.eq.f32.partialorder %v2292_v42, %v2418_v16  ;;  %vm889_vm6 = vcmp.eq.f32.partialorder %v2300_v3, %v2418_v16  ;;  %v667_v62 = vsub.f32 1.5, %v666_v31  ;;  %v675_v6 = vmul.f32 %v2415_v37, %v674_v50 }
 0x170   : > { %vm1155_vm3 = vcmp.eq.f32.partialorder %v2270_v47, %v2425_v43  ;;  %vm1156_vm4 = vcmp.eq.f32.partialorder %v2273_v40, %v2425_v43  ;;  %vm1157_vm7 = vcmp.eq.f32.partialorder %v2276_v41, %v2425_v43  ;;  %vm1159_vm8 = vcmp.eq.f32.partialorder %v2308_v44, %v2425_v43 }
 0x171   : > { %vm1160_vm9 = vcmp.eq.f32.partialorder %v2321_v51, %v2425_v43  ;;  %vm1161_vm10 = vcmp.eq.f32.partialorder %v2327_v34, %v2425_v43  ;;  %v2454_v9 = vsel %vm1155_vm3, -inf, %v2270_v47  ;;  %vm1158_vm15 = vcmp.eq.f32.partialorder %v2345_v22, %v2425_v43 }
 0x172   : > { %v2463_v59 = vsel %vm1156_vm4, -inf, %v2273_v40  ;;  %v2466_v29 = vsel %vm1157_vm7, -inf, %v2276_v41  ;;  %v2469_v2 = vsel %vm1159_vm8, -inf, %v2308_v44  ;;  %v2472_v47 = vsel %vm1160_vm9, -inf, %v2321_v51  ;;  %vm2489_vm4 = vmor %vm609_vm11, %vm610_vm12 }
 0x173   : > { %v2475_v21 = vsel %vm1161_vm10, -inf, %v2327_v34  ;;  %v1169_v38 = vmax.f32 %v2454_v9, %v2469_v2  ;;  %v608_v24 = vmul.f32 %v2391_v36, %v607_v52  ;;  %vm629_vm3 = vweird.f32 %v2404_v20  ;;  %vm2516_vm11 = vmor %vm669_vm13, %vm670_vm14 }
 0x174   : > { %v1170_v40 = vmax.f32 %v2463_v59, %v2472_v47  ;;  %v1171_v41 = vsel %vm750_vm0, %v2475_v21, -inf  ;;  %v668_v51 = vmul.f32 %v2393_v63, %v667_v62  ;;  %v617_v34 = vsub.f32 1.5, %v616_v4 }
 0x175   : > { %v554_v60 = vpop.xlane.xlu0 %553  ;;  %v1172_v32 = vmax.f32 %v2466_v29, %v1171_v41  ;;  %v612_v17 = vsel %vm2489_vm4, %v2391_v36, %v608_v24  ;;  %v676_v28 = vmul.f32 0.5, %v675_v6  ;;  %v624_v1 = vmul.f32 %v2458_v39, %v2404_v20 }
 0x176   : > { %v2504_v27 = vsel %vm885_vm2, -inf, %v2292_v42  ;;  %v2510_v12 = vsel %vm1158_vm15, -inf, %v2345_v22  ;;  %v1173_v49 = vmax.f32 %v1169_v38, %v1170_v40  ;;  %v618_v14 = vmul.f32 %v2399_v0, %v617_v34 }
 0x177   : > { %v2525_v42 = vsel %vm889_vm6, -inf, %v2300_v3  ;;  %v1174_v22 = vmax.f32 %v1172_v32, %v2510_v12  ;;  %vm3006_vm12 = vweird.f32 %v2356_v13  ;;  %v677_v10 = vsub.f32 1.5, %v676_v28 }
 0x178   : > { %vm621_vm15 = vmor %vm3006_vm12, %vm620_vm1  ;;  %v625_v31 = vmul.f32 %v2458_v39, %v624_v1  ;;  %v725_v5 = vmul.f32 %v612_v17, %v2097_v7  ;;  %v672_v50 = vsel %vm2516_vm11, %v2393_v63, %v668_v51  ;;  %1777 = vrsqrt.f32 %v2441_v61 }
 0x179   : > { %v622_v52 = vsel %vm621_vm15, %v2399_v0, %v618_v14  ;;  %v1175_v3 = vmax.f32 %v1173_v49, %v1174_v22  ;;  %v678_v62 = vmul.f32 %v2415_v37, %v677_v10  ;;  %vm3007_vm13 = vweird.f32 %v2415_v37 }
 0x17a   : > { %v726_v4 = vmul.f32 %v622_v52, %v2105_v15  ;;  %v626_v13 = vmul.f32 0.5, %v625_v31  ;;  %vm681_vm14 = vmor %vm679_vm5, %vm3007_vm13  ;;  %vm630_vm1 = vweird.f32 %v2458_v39  ;;  %v2547_v7 = vmax.f32 %v2423_v56, 1e-24 }
 0x17b   : > { %v2549_v63 = vmax.f32 %v554_v60, 1e-24  ;;  %v2553_v0 = vadd.f32 %v2418_v16, %v2381_v8  ;;  %v1176_v15 = vrot.slane %v1175_v3, 4  ;;  %v682_v38 = vsel %vm681_vm14, %v2415_v37, %v678_v62  ;;  %vm2574_vm2 = vmor %vm629_vm3, %vm630_vm1 }
 0x17c   : > { %v1659_v6 = vpack.c.bf16 %v726_v4, %v725_v5  ;;  %v627_v24 = vsub.f32 1.5, %v626_v13  ;;  %v2558_v46 = vsel %vm750_vm0, %v2525_v42, -inf  ;;  %v731_v40 = vmul.f32 %v672_v50, %v2101_v11 }
 0x17d   : > { %v732_v56 = vmul.f32 %v682_v38, %v2109_v18  ;;  %1779 = vrsqrt.f32 %v2547_v7  ;;  %v556_v41 = vpop.xlane.xlu2 %555  ;;  %v564_v44 = vpop.xlane.xlu0 %563  ;;  %v1177_v8 = vmax.f32 %v1175_v3, %v1176_v15  ;;  %v900_v1 = vmax.f32 %v2504_v27, %v2558_v46 }
 0x17e   : > { %1677 = vst [vmem:[%s2409_s22 + $0x8] sm:$0xff] %v1659_v6   ;;  %v628_v51 = vmul.f32 %v2458_v39, %v627_v24  ;;  %1781 = vrsqrt.f32 %v2549_v63  ;;  %v2566_v37 = vmax.f32 %v556_v41, 1e-24  ;;  %v2568_v34 = vpop.eup %1777  ;;  %v2578_v18 = vmax.f32 %v564_v44, 1e-24 }
 0x17f   : > { %v1669_v60 = vpack.c.bf16 %v732_v56, %v731_v40  ;;  %v1178_v32 = vrot.slane %v1177_v8, 2  ;;  %v684_v28 = vmul.f32 %v2568_v34, %v2441_v61  ;;  %vm689_vm5 = vweird.f32 %v2441_v61 }
 0x180   : > { %v632_v17 = vsel %vm2574_vm2, %v2458_v39, %v628_v51  ;;  %1783 = vrsqrt.f32 %v2566_v37  ;;  %vm883_vm6 = vcmp.eq.f32.partialorder %v2285_v25, %v2418_v16  ;;  %vm690_vm7 = vweird.f32 %v2568_v34 }
 0x181   : > { %1679 = vst [vmem:[%s2409_s22 + $0x20] sm:$0xff] %v1669_v60   ;;  %v1179_v20 = vmax.f32 %v1177_v8, %v1178_v32  ;;  %v685_v49 = vmul.f32 %v2568_v34, %v684_v28  ;;  %vm884_vm8 = vcmp.eq.f32.partialorder %v2290_v33, %v2418_v16  ;;  %v2599_v14 = vmul.f32 %v632_v17, %v2113_v23 }
 0x182   : > { %v568_v39 = vpop.xlane.xlu1 %567  ;;  %1785 = vrsqrt.f32 %v2578_v18  ;;  %vm886_vm9 = vcmp.eq.f32.partialorder %v2294_v54, %v2418_v16  ;;  %vm639_vm10 = vweird.f32 %v2547_v7  ;;  %vm887_vm3 = vcmp.eq.f32.partialorder %v2296_v55, %v2418_v16 }
 0x183   : > { %v2596_v36 = vpop.eup %1779  ;;  %v2602_v22 = vmax.f32 %v568_v39, 1e-24  ;;  %v1180_v31 = vrot.slane %v1179_v20, 1  ;;  %v686_v5 = vmul.f32 0.5, %v685_v49  ;;  %vm649_vm4 = vweird.f32 %v2549_v63 }
 0x184   : > { %v2606_v10 = vpop.eup %1781  ;;  %v634_v50 = vmul.f32 %v2596_v36, %v2547_v7  ;;  %vm888_vm11 = vcmp.eq.f32.partialorder %v2298_v58, %v2418_v16  ;;  %v2623_v52 = vsel %vm883_vm6, -inf, %v2285_v25  ;;  %vm640_vm12 = vweird.f32 %v2596_v36  ;;  %vm2669_vm6 = vmor %vm689_vm5, %vm690_vm7 }
 0x185   : > { %v644_v23 = vmul.f32 %v2606_v10, %v2549_v63  ;;  %1787 = vrsqrt.f32 %v2602_v22  ;;  %v2625_v3 = vmax.f32 %v1179_v20, %v1180_v31  ;;  %v687_v4 = vsub.f32 1.5, %v686_v5 }
 0x186   : > { %v635_v62 = vmul.f32 %v2596_v36, %v634_v50  ;;  %vm751_vm15 = vsmask.f32 256  ;;  %v2629_v13 = vpop.eup %1783  ;;  %vm650_vm13 = vweird.f32 %v2606_v10  ;;  %v2637_v25 = vsel %vm884_vm8, -inf, %v2290_v33 }
 0x187   : > { %v645_v15 = vmul.f32 %v2606_v10, %v644_v23  ;;  %v2643_v6 = vsel %vm886_vm9, -inf, %v2294_v54  ;;  %vm1185_vm14 = vcmp.eq.f32.partialorder %v2466_v29, %v2625_v3  ;;  %vm1189_vm1 = vcmp.eq.f32.partialorder %v2475_v21, %v2625_v3  ;;  %vm641_vm9 = vmor %vm639_vm10, %vm640_vm12 }
 0x188   : > { %v688_v38 = vmul.f32 %v2568_v34, %v687_v4  ;;  %v636_v24 = vmul.f32 0.5, %v635_v62  ;;  %v2650_v40 = vpop.eup %1785  ;;  %v2653_v33 = vsel %vm1185_vm14, -inf, %v2466_v29  ;;  %v2656_v56 = vsel %vm1189_vm1, -inf, %v2475_v21 }
 0x189   : > { %v646_v41 = vmul.f32 0.5, %v645_v15  ;;  %v654_v54 = vmul.f32 %v2629_v13, %v2566_v37  ;;  %vm659_vm2 = vweird.f32 %v2566_v37  ;;  %v2663_v44 = vsel %vm750_vm0, %v2656_v56, -inf }
 0x18a   : > { %v637_v21 = vsub.f32 1.5, %v636_v24  ;;  %v566_v8 = vpop.xlane.xlu1 %565  ;;  %v2677_v51 = vsel %vm887_vm3, -inf, %v2296_v55  ;;  %v2683_v60 = vsel %vm888_vm11, -inf, %v2298_v58  ;;  %v692_v61 = vsel %vm2669_vm6, %v2568_v34, %v688_v38  ;;  %vm651_vm11 = vmor %vm649_vm4, %vm650_vm13 }
 0x18b   : > { %v2685_v11 = vpop.eup %1787  ;;  %v647_v32 = vsub.f32 1.5, %v646_v41  ;;  %v655_v17 = vmul.f32 %v2629_v13, %v654_v54  ;;  %vm660_vm5 = vweird.f32 %v2629_v13  ;;  %vm699_vm7 = vweird.f32 %v2578_v18  ;;  %vm2726_vm4 = vmand %vm750_vm0, %vm751_vm15 }
 0x18c   : > { %v1200_v55 = vmax.f32 %v2653_v33, %v2663_v44  ;;  %v638_v16 = vmul.f32 %v2596_v36, %v637_v21  ;;  %v694_v58 = vmul.f32 %v2650_v40, %v2578_v18  ;;  %v714_v28 = vmul.f32 %v2685_v11, %v2602_v22  ;;  %vm661_vm12 = vmor %vm659_vm2, %vm660_vm5 }
 0x18d   : > { %vm719_vm8 = vweird.f32 %v2602_v22  ;;  %v648_v34 = vmul.f32 %v2606_v10, %v647_v32  ;;  %v656_v20 = vmul.f32 0.5, %v655_v17  ;;  %vm700_vm3 = vweird.f32 %v2650_v40 }
 0x18e   : > { %v2707_v49 = vmax.f32 %v566_v8, 1e-24  ;;  %v642_v39 = vsel %vm641_vm9, %v2596_v36, %v638_v16  ;;  %v695_v31 = vmul.f32 %v2650_v40, %v694_v58  ;;  %v715_v7 = vmul.f32 %v2685_v11, %v714_v28  ;;  %vm701_vm13 = vmor %vm699_vm7, %vm700_vm3 }
 0x18f   : > { %v897_v5 = vmax.f32 %v2623_v52, %v2677_v51  ;;  %v728_v50 = vmul.f32 %v642_v39, %v2119_v30  ;;  %v652_v23 = vsel %vm651_vm11, %v2606_v10, %v648_v34  ;;  %v657_v4 = vsub.f32 1.5, %v656_v20  ;;  %v753_v30 = vld [vmem:[%s2409_s22 + $0x18] sm:$0x1] }
 0x190   : > { %1789 = vrsqrt.f32 %v2707_v49  ;;  %v729_v36 = vmul.f32 %v652_v23, %v2125_v35  ;;  %v696_v62 = vmul.f32 0.5, %v695_v31  ;;  %v716_v63 = vmul.f32 0.5, %v715_v7 }
 0x191   : > { %vm720_vm10 = vweird.f32 %v2685_v11  ;;  %v1664_v15 = vpack.c.bf16 %v728_v50, %v2599_v14  ;;  %v658_v10 = vmul.f32 %v2629_v13, %v657_v4  ;;  %v898_v24 = vmax.f32 %v2637_v25, %v2683_v60 }
 0x192   : > { %v902_v35 = vmax.f32 %v900_v1, %v2643_v6  ;;  %v743_v41 = vpack.c.bf16 %v729_v36, %v729_v36  ;;  %v697_v14 = vsub.f32 1.5, %v696_v62  ;;  %v717_v54 = vsub.f32 1.5, %v716_v63  ;;  %vm721_vm14 = vmor %vm719_vm8, %vm720_vm10 }
 0x193   : > { %v1154_v29 = vadd.f32 %v2425_v43, %v2385_v19  ;;  %v733_v21 = vmul.f32 %v692_v61, %v2117_v26  ;;  %1678 = vst [vmem:[%s2409_s22 + $0x10] sm:$0xff] %v1664_v15   ;;  %v662_v8 = vsel %vm661_vm12, %v2629_v13, %v658_v10  ;;  %v901_v32 = vmax.f32 %v897_v5, %v898_v24 }
 0x194   : > { %vm1183_vm15 = vcmp.eq.f32.partialorder %v2454_v9, %v2625_v3  ;;  %v754_v46 = vsel %vm2726_vm4, %v743_v41, %v753_v30  ;;  %v730_v37 = vmul.f32 %v662_v8, %v2139_v48  ;;  %v698_v1 = vmul.f32 %v2650_v40, %v697_v14 }
 0x195   : > { %v718_v26 = vmul.f32 %v2685_v11, %v717_v54  ;;  %755 = vst [vmem:[%s2409_s22 + $0x18] sm:$0x1] %v754_v46  ;;  %v903_v43 = vmax.f32 %v901_v32, %v902_v35  ;;  %v2764_v48 = vadd.f32 %v2625_v3, %v1154_v29  ;;  %vm1184_vm1 = vcmp.eq.f32.partialorder %v2463_v59, %v2625_v3 }
 0x196   : > { %v1790_v19 = vpop.eup %1789  ;;  %vm1186_vm2 = vcmp.eq.f32.partialorder %v2510_v12, %v2625_v3  ;;  %v1040_v18 = vpack.c.bf16 %v730_v37, %v730_v37  ;;  %v702_v13 = vsel %vm701_vm13, %v2650_v40, %v698_v1  ;;  %vm1187_vm6 = vcmp.eq.f32.partialorder %v2469_v2, %v2625_v3 }
 0x197   : > { %v722_v61 = vsel %vm721_vm14, %v2685_v11, %v718_v26  ;;  %v704_v17 = vmul.f32 %v1790_v19, %v2707_v49  ;;  %v734_v22 = vmul.f32 %v702_v13, %v2137_v45  ;;  %v904_v58 = vrot.slane %v903_v43, 4 }
 0x198   : > { %v736_v16 = vmul.f32 %v722_v61, %v2147_v57  ;;  %1606 = vst [vmem:[%s2409_s22 + $0x1c] sm:$0xf] %v1040_v18  ;;  %vm1188_vm5 = vcmp.eq.f32.partialorder %v2472_v47, %v2625_v3  ;;  %v2784_v40 = vsel %vm1183_vm15, -inf, %v2454_v9  ;;  %v2787_v45 = vsel %vm1184_vm1, -inf, %v2463_v59  ;;  %v1612_v3 = vld [vmem:[%s2409_s22 + $0x34] sm:$0x1] }
 0x199   : > { %v705_v28 = vmul.f32 %v1790_v19, %v704_v17  ;;  %v1674_v57 = vpack.c.bf16 %v734_v22, %v733_v21  ;;  %v905_v34 = vmax.f32 %v903_v43, %v904_v58  ;;  %v2793_v39 = vsel %vm1186_vm2, -inf, %v2510_v12 }
 0x19a   : > { %v1046_v11 = vpack.c.bf16 %v736_v16, %v736_v16  ;;  %v2796_v31 = vsel %vm1187_vm6, -inf, %v2469_v2  ;;  %v2799_v9 = vsel %vm1188_vm5, -inf, %v2472_v47  ;;  %v1202_v12 = vmax.f32 %v1200_v55, %v2793_v39 }
 0x19b   : > { %v706_v20 = vmul.f32 0.5, %v705_v28  ;;  %1680 = vst [vmem:[%s2409_s22 + $0x28] sm:$0xff] %v1674_v57   ;;  %v906_v59 = vrot.slane %v905_v34, 2  ;;  %v1197_v7 = vmax.f32 %v2784_v40, %v2796_v31  ;;  %v1198_v5 = vmax.f32 %v2787_v45, %v2799_v9 }
 0x19c   : > { %vm710_vm7 = vweird.f32 %v1790_v19  ;;  %v1055_v2 = vsel %vm2726_vm4, %v1046_v11, %v1612_v3  ;;  %vm709_vm8 = vweird.f32 %v2707_v49 }
 0x19d   : > { %v707_v50 = vsub.f32 1.5, %v706_v20  ;;  %v907_v47 = vmax.f32 %v905_v34, %v906_v59  ;;  %v1201_v23 = vmax.f32 %v1197_v7, %v1198_v5  ;;  %1613 = vst [vmem:[%s2409_s22 + $0x34] sm:$0x1] %v1055_v2  ;;  %vm711_vm9 = vmor %vm709_vm8, %vm710_vm7 }
 0x19f   : > { %v708_v4 = vmul.f32 %v1790_v19, %v707_v50  ;;  %v908_v36 = vrot.slane %v907_v47, 1  ;;  %v1203_v62 = vmax.f32 %v1201_v23, %v1202_v12 }
 0x1a1   : > { %v712_v63 = vsel %vm711_vm9, %v1790_v19, %v708_v4  ;;  %v909_v55 = vmax.f32 %v907_v47, %v908_v36  ;;  %v1204_v15 = vrot.slane %v1203_v62, 4 }
 0x1a2   : > { %v735_v44 = vmul.f32 %v712_v63, %v2145_v53 }
 0x1a3   : > { %v2817_v10 = vadd.f32 %v909_v55, %v2553_v0  ;;  %vm911_vm3 = vcmp.eq.f32.partialorder %v2623_v52, %v909_v55  ;;  %vm912_vm11 = vcmp.eq.f32.partialorder %v2637_v25, %v909_v55  ;;  %vm913_vm10 = vcmp.eq.f32.partialorder %v2504_v27, %v909_v55 }
 0x1a4   : > { %v1045_v30 = vpack.c.bf16 %v735_v44, %v735_v44  ;;  %vm915_vm4 = vcmp.eq.f32.partialorder %v2677_v51, %v909_v55  ;;  %vm916_vm12 = vcmp.eq.f32.partialorder %v2683_v60, %v909_v55  ;;  %vm917_vm15 = vcmp.eq.f32.partialorder %v2525_v42, %v909_v55 }
 0x1a5   : > { %v918_v53 = vsel %vm911_vm3, -inf, %v2623_v52  ;;  %v919_v49 = vsel %vm912_vm11, -inf, %v2637_v25  ;;  %v920_v0 = vsel %vm913_vm10, -inf, %v2504_v27  ;;  %vm914_vm13 = vcmp.eq.f32.partialorder %v2643_v6, %v909_v55 }
 0x1a6   : > { %1611 = vst [vmem:[%s2409_s22 + $0x30] sm:$0xf] %v1045_v30  ;;  %v922_v38 = vsel %vm915_vm4, -inf, %v2677_v51  ;;  %v923_v24 = vsel %vm916_vm12, -inf, %v2683_v60  ;;  %v924_v35 = vsel %vm917_vm15, -inf, %v2525_v42  ;;  %v1205_v29 = vmax.f32 %v1203_v62, %v1204_v15 }
 0x1a7   : > { %v925_v41 = vmax.f32 %v918_v53, %v922_v38  ;;  %v926_v14 = vmax.f32 %v919_v49, %v923_v24  ;;  %v927_v54 = vsel %vm750_vm0, %v924_v35, -inf  ;;  %v921_v52 = vsel %vm914_vm13, -inf, %v2643_v6 }
 0x1a8   : > { %v928_v21 = vmax.f32 %v920_v0, %v927_v54  ;;  %v1206_v25 = vrot.slane %v1205_v29, 2 }
 0x1a9   : > { %v929_v8 = vmax.f32 %v925_v41, %v926_v14 }
 0x1aa   : > { %v930_v32 = vmax.f32 %v928_v21, %v921_v52  ;;  %v1207_v27 = vmax.f32 %v1205_v29, %v1206_v25 }
 0x1ac   : > { %v931_v46 = vmax.f32 %v929_v8, %v930_v32  ;;  %v1208_v37 = vrot.slane %v1207_v27, 1 }
 0x1ae   : > { %v932_v1 = vrot.slane %v931_v46, 4  ;;  %v1209_v51 = vmax.f32 %v1207_v27, %v1208_v37 }
 0x1b0   : > { %v933_v26 = vmax.f32 %v931_v46, %v932_v1  ;;  %v2836_v60 = vadd.f32 %v1209_v51, %v2764_v48  ;;  %vm1211_vm14 = vcmp.eq.f32.partialorder %v2784_v40, %v1209_v51  ;;  %vm1212_vm1 = vcmp.eq.f32.partialorder %v2787_v45, %v1209_v51 }
 0x1b1   : > { %vm1213_vm2 = vcmp.eq.f32.partialorder %v2653_v33, %v1209_v51  ;;  %vm1215_vm6 = vcmp.eq.f32.partialorder %v2796_v31, %v1209_v51  ;;  %vm1216_vm5 = vcmp.eq.f32.partialorder %v2799_v9, %v1209_v51  ;;  %vm1217_vm7 = vcmp.eq.f32.partialorder %v2656_v56, %v1209_v51 }
 0x1b2   : > { %v934_v42 = vrot.slane %v933_v26, 2  ;;  %v1218_v6 = vsel %vm1211_vm14, -inf, %v2784_v40  ;;  %v1219_v19 = vsel %vm1212_vm1, -inf, %v2787_v45  ;;  %v1220_v48 = vsel %vm1213_vm2, -inf, %v2653_v33 }
 0x1b3   : > { %v1222_v18 = vsel %vm1215_vm6, -inf, %v2796_v31  ;;  %v1223_v13 = vsel %vm1216_vm5, -inf, %v2799_v9  ;;  %vm1214_vm8 = vcmp.eq.f32.partialorder %v2793_v39, %v1209_v51  ;;  %v1224_v61 = vsel %vm1217_vm7, -inf, %v2656_v56 }
 0x1b4   : > { %v935_v43 = vmax.f32 %v933_v26, %v934_v42  ;;  %v1225_v17 = vmax.f32 %v1218_v6, %v1222_v18  ;;  %v1226_v22 = vmax.f32 %v1219_v19, %v1223_v13  ;;  %v1227_v58 = vsel %vm750_vm0, %v1224_v61, -inf }
 0x1b5   : > { %v1228_v28 = vmax.f32 %v1220_v48, %v1227_v58  ;;  %v1221_v45 = vsel %vm1214_vm8, -inf, %v2793_v39 }
 0x1b6   : > { %v936_v16 = vrot.slane %v935_v43, 1  ;;  %v1229_v57 = vmax.f32 %v1225_v17, %v1226_v22 }
 0x1b7   : > { %v1230_v33 = vmax.f32 %v1228_v28, %v1221_v45 }
 0x1b8   : > { %v2852_v40 = vmax.f32 %v935_v43, %v936_v16 }
 0x1b9   : > { %v1231_v9 = vmax.f32 %v1229_v57, %v1230_v33 }
 0x1ba   : > { %vm939_vm9 = vcmp.eq.f32.partialorder %v918_v53, %v2852_v40  ;;  %vm940_vm3 = vcmp.eq.f32.partialorder %v919_v49, %v2852_v40  ;;  %vm941_vm11 = vcmp.eq.f32.partialorder %v920_v0, %v2852_v40  ;;  %vm943_vm10 = vcmp.eq.f32.partialorder %v922_v38, %v2852_v40 }
 0x1bb   : > { %vm944_vm4 = vcmp.eq.f32.partialorder %v923_v24, %v2852_v40  ;;  %vm945_vm12 = vcmp.eq.f32.partialorder %v924_v35, %v2852_v40  ;;  %vm942_vm15 = vcmp.eq.f32.partialorder %v921_v52, %v2852_v40  ;;  %v946_v56 = vsel %vm939_vm9, -inf, %v918_v53 }
 0x1bc   : > { %v947_v11 = vsel %vm940_vm3, -inf, %v919_v49  ;;  %v948_v34 = vsel %vm941_vm11, -inf, %v920_v0  ;;  %v950_v20 = vsel %vm943_vm10, -inf, %v922_v38  ;;  %v951_v39 = vsel %vm944_vm4, -inf, %v923_v24 }
 0x1bd   : > { %v952_v31 = vsel %vm945_vm12, -inf, %v924_v35  ;;  %v953_v59 = vmax.f32 %v946_v56, %v950_v20  ;;  %v954_v7 = vmax.f32 %v947_v11, %v951_v39  ;;  %v1232_v3 = vrot.slane %v1231_v9, 4 }
 0x1be   : > { %v955_v5 = vsel %vm750_vm0, %v952_v31, -inf  ;;  %v949_v50 = vsel %vm942_vm15, -inf, %v921_v52 }
 0x1bf   : > { %v956_v12 = vmax.f32 %v948_v34, %v955_v5  ;;  %v957_v2 = vmax.f32 %v953_v59, %v954_v7  ;;  %v1233_v23 = vmax.f32 %v1231_v9, %v1232_v3 }
 0x1c1   : > { %v958_v47 = vmax.f32 %v956_v12, %v949_v50  ;;  %v1234_v36 = vrot.slane %v1233_v23, 2 }
 0x1c3   : > { %v959_v4 = vmax.f32 %v957_v2, %v958_v47  ;;  %v1235_v63 = vmax.f32 %v1233_v23, %v1234_v36 }
 0x1c5   : > { %v960_v62 = vrot.slane %v959_v4, 4  ;;  %v1236_v55 = vrot.slane %v1235_v63, 1 }
 0x1c7   : > { %v961_v44 = vmax.f32 %v959_v4, %v960_v62  ;;  %v2863_v30 = vmax.f32 %v1235_v63, %v1236_v55 }
 0x1c9   : > { %v962_v15 = vrot.slane %v961_v44, 2  ;;  %vm1239_vm13 = vcmp.eq.f32.partialorder %v1218_v6, %v2863_v30  ;;  %vm1240_vm14 = vcmp.eq.f32.partialorder %v1219_v19, %v2863_v30  ;;  %vm1241_vm1 = vcmp.eq.f32.partialorder %v1220_v48, %v2863_v30 }
 0x1ca   : > { %vm1243_vm2 = vcmp.eq.f32.partialorder %v1222_v18, %v2863_v30  ;;  %vm1244_vm6 = vcmp.eq.f32.partialorder %v1223_v13, %v2863_v30  ;;  %vm1245_vm5 = vcmp.eq.f32.partialorder %v1224_v61, %v2863_v30  ;;  %v2871_v0 = vsel %vm1239_vm13, -inf, %v1218_v6 }
 0x1cb   : > { %v963_v53 = vmax.f32 %v961_v44, %v962_v15  ;;  %v2873_v38 = vsel %vm1240_vm14, -inf, %v1219_v19  ;;  %v2875_v24 = vsel %vm1243_vm2, -inf, %v1222_v18  ;;  %v2877_v35 = vsel %vm1244_vm6, -inf, %v1223_v13 }
 0x1cc   : > { %vm1242_vm7 = vcmp.eq.f32.partialorder %v1221_v45, %v2863_v30  ;;  %v2882_v14 = vsel %vm1245_vm5, -inf, %v1224_v61  ;;  %v2884_v54 = vsel %vm1241_vm1, -inf, %v1220_v48  ;;  %v1253_v29 = vmax.f32 %v2871_v0, %v2875_v24 }
 0x1cd   : > { %v964_v49 = vrot.slane %v963_v53, 1  ;;  %v1254_v21 = vmax.f32 %v2873_v38, %v2877_v35  ;;  %v1255_v52 = vsel %vm750_vm0, %v2882_v14, -inf  ;;  %v2898_v8 = vsel %vm1242_vm7, -inf, %v1221_v45 }
 0x1ce   : > { %v1256_v51 = vmax.f32 %v2884_v54, %v1255_v52 }
 0x1cf   : > { %v2879_v41 = vmax.f32 %v963_v53, %v964_v49  ;;  %v1257_v19 = vmax.f32 %v1253_v29, %v1254_v21 }
 0x1d0   : > { %v1258_v48 = vmax.f32 %v1256_v51, %v2898_v8 }
 0x1d1   : > { %vm967_vm8 = vcmp.eq.f32.partialorder %v946_v56, %v2879_v41  ;;  %vm968_vm9 = vcmp.eq.f32.partialorder %v947_v11, %v2879_v41  ;;  %vm969_vm3 = vcmp.eq.f32.partialorder %v948_v34, %v2879_v41  ;;  %vm971_vm11 = vcmp.eq.f32.partialorder %v950_v20, %v2879_v41 }
 0x1d2   : > { %vm972_vm10 = vcmp.eq.f32.partialorder %v951_v39, %v2879_v41  ;;  %vm973_vm4 = vcmp.eq.f32.partialorder %v952_v31, %v2879_v41  ;;  %vm970_vm12 = vcmp.eq.f32.partialorder %v949_v50, %v2879_v41  ;;  %v974_v25 = vsel %vm967_vm8, -inf, %v946_v56 }
 0x1d3   : > { %v975_v32 = vsel %vm968_vm9, -inf, %v947_v11  ;;  %v976_v27 = vsel %vm969_vm3, -inf, %v948_v34  ;;  %v978_v46 = vsel %vm971_vm11, -inf, %v950_v20  ;;  %v979_v37 = vsel %vm972_vm10, -inf, %v951_v39 }
 0x1d4   : > { %v980_v1 = vsel %vm973_vm4, -inf, %v952_v31  ;;  %v981_v26 = vmax.f32 %v974_v25, %v978_v46  ;;  %v982_v42 = vmax.f32 %v975_v32, %v979_v37  ;;  %v977_v18 = vsel %vm970_vm12, -inf, %v949_v50 }
 0x1d5   : > { %v983_v6 = vsel %vm750_vm0, %v980_v1, -inf  ;;  %v1259_v17 = vmax.f32 %v1257_v19, %v1258_v48 }
 0x1d6   : > { %v984_v43 = vmax.f32 %v976_v27, %v983_v6  ;;  %v985_v13 = vmax.f32 %v981_v26, %v982_v42 }
 0x1d7   : > { %v1260_v16 = vrot.slane %v1259_v17, 4 }
 0x1d8   : > { %v986_v61 = vmax.f32 %v984_v43, %v977_v18 }
 0x1d9   : > { %v1261_v28 = vmax.f32 %v1259_v17, %v1260_v16 }
 0x1da   : > { %v987_v22 = vmax.f32 %v985_v13, %v986_v61 }
 0x1db   : > { %v1262_v57 = vrot.slane %v1261_v28, 2 }
 0x1dc   : > { %v988_v58 = vrot.slane %v987_v22, 4 }
 0x1dd   : > { %v1263_v56 = vmax.f32 %v1261_v28, %v1262_v57 }
 0x1de   : > { %v989_v45 = vmax.f32 %v987_v22, %v988_v58 }
 0x1df   : > { %v1264_v34 = vrot.slane %v1263_v56, 1 }
 0x1e0   : > { %v990_v33 = vrot.slane %v989_v45, 2 }
 0x1e1   : > { %v2904_v39 = vmax.f32 %v1263_v56, %v1264_v34 }
 0x1e2   : > { %v991_v11 = vmax.f32 %v989_v45, %v990_v33 }
 0x1e3   : > { %vm1267_vm15 = vcmp.eq.f32.partialorder %v2871_v0, %v2904_v39  ;;  %vm1268_vm13 = vcmp.eq.f32.partialorder %v2873_v38, %v2904_v39  ;;  %vm1269_vm14 = vcmp.eq.f32.partialorder %v2884_v54, %v2904_v39  ;;  %vm1270_vm1 = vcmp.eq.f32.partialorder %v2898_v8, %v2904_v39 }
 0x1e4   : > { %v992_v20 = vrot.slane %v991_v11, 1  ;;  %vm1271_vm7 = vcmp.eq.f32.partialorder %v2875_v24, %v2904_v39  ;;  %vm1272_vm11 = vcmp.eq.f32.partialorder %v2877_v35, %v2904_v39  ;;  %vm1273_vm4 = vcmp.eq.f32.partialorder %v2882_v14, %v2904_v39 }
 0x1e5   : > { %v1274_v23 = vsel %vm1267_vm15, -inf, %v2871_v0  ;;  %v1275_v62 = vsel %vm1268_vm13, -inf, %v2873_v38  ;;  %v1276_v63 = vsel %vm1269_vm14, -inf, %v2884_v54  ;;  %v1278_v55 = vsel %vm1271_vm7, -inf, %v2875_v24 }
 0x1e6   : > { %v993_v31 = vmax.f32 %v991_v11, %v992_v20  ;;  %v1279_v15 = vsel %vm1272_vm11, -inf, %v2877_v35  ;;  %v1280_v53 = vsel %vm1273_vm4, -inf, %v2882_v14  ;;  %v1281_v0 = vmax.f32 %v1274_v23, %v1278_v55 }
 0x1e7   : > { %v1282_v38 = vmax.f32 %v1275_v62, %v1279_v15  ;;  %v1283_v29 = vsel %vm750_vm0, %v1280_v53, -inf  ;;  %v1277_v52 = vsel %vm1270_vm1, -inf, %v2898_v8 }
 0x1e8   : > { %vm995_vm2 = vcmp.eq.f32.partialorder %v974_v25, %v993_v31  ;;  %vm996_vm6 = vcmp.eq.f32.partialorder %v975_v32, %v993_v31  ;;  %vm997_vm5 = vcmp.eq.f32.partialorder %v976_v27, %v993_v31  ;;  %vm999_vm8 = vcmp.eq.f32.partialorder %v978_v46, %v993_v31 }
 0x1e9   : > { %vm1000_vm9 = vcmp.eq.f32.partialorder %v979_v37, %v993_v31  ;;  %vm1001_vm3 = vcmp.eq.f32.partialorder %v980_v1, %v993_v31  ;;  %vm998_vm10 = vcmp.eq.f32.partialorder %v977_v18, %v993_v31  ;;  %v1002_v9 = vsel %vm995_vm2, -inf, %v974_v25 }
 0x1ea   : > { %v1003_v59 = vsel %vm996_vm6, -inf, %v975_v32  ;;  %v1004_v7 = vsel %vm997_vm5, -inf, %v976_v27  ;;  %v1006_v5 = vsel %vm999_vm8, -inf, %v978_v46  ;;  %v1007_v12 = vsel %vm1000_vm9, -inf, %v979_v37 }
 0x1eb   : > { %v1008_v3 = vsel %vm1001_vm3, -inf, %v980_v1  ;;  %v1009_v50 = vmax.f32 %v1002_v9, %v1006_v5  ;;  %v1010_v2 = vmax.f32 %v1003_v59, %v1007_v12  ;;  %v1005_v4 = vsel %vm998_vm10, -inf, %v977_v18 }
 0x1ec   : > { %v1011_v47 = vsel %vm750_vm0, %v1008_v3, -inf  ;;  %v1284_v21 = vmax.f32 %v1276_v63, %v1283_v29  ;;  %v1285_v24 = vmax.f32 %v1281_v0, %v1282_v38  ;;  %v938_v1 = vadd.f32 %v2852_v40, %v2817_v10 }
 0x1ed   : > { %v1012_v36 = vmax.f32 %v1004_v7, %v1011_v47  ;;  %v1013_v44 = vmax.f32 %v1009_v50, %v1010_v2  ;;  %v1238_v7 = vadd.f32 %v2863_v30, %v2836_v60 }
 0x1ee   : > { %v1286_v25 = vmax.f32 %v1284_v21, %v1277_v52  ;;  %v966_v42 = vadd.f32 %v2879_v41, %v938_v1 }
 0x1ef   : > { %v1014_v49 = vmax.f32 %v1012_v36, %v1005_v4  ;;  %v1266_v12 = vadd.f32 %v2904_v39, %v1238_v7 }
 0x1f0   : > { %v1287_v27 = vmax.f32 %v1285_v24, %v1286_v25  ;;  %v994_v43 = vadd.f32 %v993_v31, %v966_v42 }
 0x1f1   : > { %v1015_v54 = vmax.f32 %v1013_v44, %v1014_v49 }
 0x1f2   : > { %v1288_v35 = vrot.slane %v1287_v27, 4 }
 0x1f3   : > { %v1016_v32 = vrot.slane %v1015_v54, 4 }
 0x1f4   : > { %v1289_v14 = vmax.f32 %v1287_v27, %v1288_v35 }
 0x1f5   : > { %v1017_v46 = vmax.f32 %v1015_v54, %v1016_v32 }
 0x1f6   : > { %v1290_v26 = vrot.slane %v1289_v14, 2 }
 0x1f7   : > { %v1018_v37 = vrot.slane %v1017_v46, 2 }
 0x1f8   : > { %v1291_v19 = vmax.f32 %v1289_v14, %v1290_v26 }
 0x1f9   : > { %v1019_v51 = vmax.f32 %v1017_v46, %v1018_v37 }
 0x1fa   : > { %v1292_v8 = vrot.slane %v1291_v19, 1 }
 0x1fb   : > { %v1020_v6 = vrot.slane %v1019_v51, 1 }
 0x1fc   : > { %v1293_v13 = vmax.f32 %v1291_v19, %v1292_v8 }
 0x1fd   : > { %v1021_v48 = vmax.f32 %v1019_v51, %v1020_v6 }
 0x1fe   : > { %vm1295_vm12 = vcmp.eq.f32.partialorder %v1274_v23, %v1293_v13  ;;  %vm1296_vm15 = vcmp.eq.f32.partialorder %v1275_v62, %v1293_v13  ;;  %vm1297_vm13 = vcmp.eq.f32.partialorder %v1276_v63, %v1293_v13  ;;  %vm1299_vm14 = vcmp.eq.f32.partialorder %v1278_v55, %v1293_v13 }
 0x1ff   : > { %v1022_v18 = vadd.f32 %v1021_v48, %v994_v43  ;;  %vm1300_vm1 = vcmp.eq.f32.partialorder %v1279_v15, %v1293_v13  ;;  %vm1301_vm2 = vcmp.eq.f32.partialorder %v1280_v53, %v1293_v13  ;;  %v1302_v10 = vsel %vm1295_vm12, -inf, %v1274_v23 }
 0x200   : > { %v1303_v40 = vsel %vm1296_vm15, -inf, %v1275_v62  ;;  %v1304_v22 = vsel %vm1297_vm13, -inf, %v1276_v63  ;;  %vm1298_vm6 = vcmp.eq.f32.partialorder %v1277_v52, %v1293_v13  ;;  %v1306_v41 = vsel %vm1299_vm14, -inf, %v1278_v55 }
 0x201   : > { %v1023_v61 = vmul.f32 0.1, %v1022_v18  ;;  %v1307_v16 = vsel %vm1300_vm1, -inf, %v1279_v15  ;;  %v1308_v58 = vsel %vm1301_vm2, -inf, %v1280_v53  ;;  %v1309_v28 = vmax.f32 %v1302_v10, %v1306_v41 }
 0x202   : > { %v1310_v45 = vmax.f32 %v1303_v40, %v1307_v16  ;;  %v1311_v57 = vsel %vm750_vm0, %v1308_v58, -inf  ;;  %v1305_v56 = vsel %vm1298_vm6, -inf, %v1277_v52  ;;  %v1294_v50 = vadd.f32 %v1293_v13, %v1266_v12 }
 0x203   : > { %v1024_v17 = vmul.f32 %v1023_v61, %v1023_v61  ;;  %v1312_v33 = vmax.f32 %v1304_v22, %v1311_v57 }
 0x204   : > { %v1313_v11 = vmax.f32 %v1309_v28, %v1310_v45 }
 0x205   : > { %1025 = vadd.xlane.f32.xlu2 %v1024_v17  ;;  %v1314_v34 = vmax.f32 %v1312_v33, %v1305_v56 }
 0x207   : > { %v1315_v20 = vmax.f32 %v1313_v11, %v1314_v34 }
 0x209   : > { %v1316_v31 = vrot.slane %v1315_v20, 4 }
 0x20b   : > { %v1317_v9 = vmax.f32 %v1315_v20, %v1316_v31 }
 0x20d   : > { %v1318_v59 = vrot.slane %v1317_v9, 2 }
 0x20f   : > { %v1319_v5 = vmax.f32 %v1317_v9, %v1318_v59 }
 0x211   : > { %v1320_v3 = vrot.slane %v1319_v5, 1 }
 0x213   : > { %v1321_v2 = vmax.f32 %v1319_v5, %v1320_v3 }
 0x215   : > { %v1322_v47 = vadd.f32 %v1321_v2, %v1294_v50 }
 0x217   : > { %v1323_v23 = vmul.f32 0.1, %v1322_v47 }
 0x219   : > { %v1324_v4 = vmul.f32 %v1323_v23, %v1323_v23 }
 0x21b   : > { %1325 = vadd.xlane.f32.xlu0 %v1324_v4 }
 0x278   : > { %v1026_v36 = vpop.xlane.xlu2 %1025 }
 0x279   : > { %v1027_v62 = vmax.f32 %v1026_v36, 1e-24 }
 0x27b   : > { %1791 = vrsqrt.f32 %v1027_v62  ;;  %vm1034_vm5 = vweird.f32 %v1027_v62 }
 0x281   : > { %v1792_v63 = vpop.eup %1791 }
 0x282   : > { %v1029_v44 = vmul.f32 %v1792_v63, %v1027_v62  ;;  %vm1035_vm0 = vweird.f32 %v1792_v63 }
 0x283   : > { %vm1036_vm7 = vmor %vm1034_vm5, %vm1035_vm0 }
 0x284   : > { %v1030_v55 = vmul.f32 %v1792_v63, %v1029_v44 }
 0x286   : > { %v1031_v15 = vmul.f32 0.5, %v1030_v55 }
 0x288   : > { %v1032_v53 = vsub.f32 1.5, %v1031_v15 }
 0x28a   : > { %v1033_v60 = vmul.f32 %v1792_v63, %v1032_v53 }
 0x28c   : > { %v1037_v30 = vsel %vm1036_vm7, %v1792_v63, %v1033_v60 }
 0x28d   : > { %v1038_v39 = vmul.f32 %v1037_v30, %v1023_v61 }
 0x28e   : > { %v1326_v49 = vpop.xlane.xlu0 %1325 }
 0x28f   : > { %1039 = vst [vmem:[%s217_s27] sm:$0x1] %v1038_v39  ;;  %v1327_v0 = vmax.f32 %v1326_v49, 1e-24 }
 0x291   : > { %1793 = vrsqrt.f32 %v1327_v0  ;;  %vm1334_vm9 = vweird.f32 %v1327_v0 }
 0x297   : > { %v1794_v38 = vpop.eup %1793 }
 0x298   : > { %v1329_v29 = vmul.f32 %v1794_v38, %v1327_v0  ;;  %vm1335_vm8 = vweird.f32 %v1794_v38 }
 0x299   : > { %vm1336_vm3 = vmor %vm1334_vm9, %vm1335_vm8 }
 0x29a   : > { %v1330_v21 = vmul.f32 %v1794_v38, %v1329_v29 }
 0x29c   : > { %v1331_v54 = vmul.f32 0.5, %v1330_v21 }
 0x29e   : > { %v1332_v52 = vsub.f32 1.5, %v1331_v54 }
 0x2a0   : > { %v1333_v24 = vmul.f32 %v1794_v38, %v1332_v52 }
 0x2a2   : > { %v1337_v25 = vsel %vm1336_vm3, %v1794_v38, %v1333_v24 }
 0x2a3   : > { %v1338_v32 = vmul.f32 %v1337_v25, %v1323_v23 }
 0x2a5   : > { %1614 = vst [vmem:[%s217_s27 + $0x1] sm:$0x1] %v1338_v32 }
 0x2a6   : > { %1882 = shalt.err (!%p1879_p12)
}
 0x2a7   : > { %s1932_s10 = smov 16   ;;  %s1933_s17 = smov 1  }
 0x2a8   : > { %1706 = dma.vmem_to_hbm [thread:$0]  (%p2021_p7), %s1364_s7, 32, %s1366_s9, %s1348_s6, %s1932_s10, %s1932_s10, %s1933_s17  }
 0x2a9 PF: > { %s1389_s20 = sand.u32 1, %s1913_s12   ;;  %p3014_p13 = scmp.ge.s32.totalorder %s1925_s15, 2 }
 0x2aa   : > { %s1390_s22 = scalar_lea.sflag [#allocation4], %s1389_s20 }
 0x2ab   : > { %p1717_p0 = pnand %p3014_p13, %p1989_p6 }
 0x2ad   : > { %p1718_p3 = pneg %p1717_p0 }
 0x2af   : > { %1908 = dma.done.wait (%p1718_p3), %s1390_s22, 32  }
 0x2b0   : > { %1910 = vsyncadd (%p1718_p3), %s1390_s22, 4294967264  ;;  %p18_p5 = scmp.ge.s32.totalorder %s2007_s26, 4   ;;  %s3015_s12 = smov %s1917_s13 }
 0x2b1   : > { %s3016_s13 = smov %s1921_s14  ;;  %s3017_s14 = smov %s2017_s4 }
 0x2b2   : > { %s3018_s15 = smov %s2007_s26  ;;  %20 = sbr.rel (!%p18_p5) target bundleno = 6 (0x6), region = 91 }
 0x2b7   :  { %1396 = vsyncpa [#allocation3], 1 }
 0x2b8   :  { %1398 = vsyncpa [#allocation3 + $0x1], 1 }
 0x2b9   :  { %1399 = vsyncpa [#allocation6], 1 }
 0x2ba   :  { %1400 = vsyncpa [#allocation4], 1 }
 0x2bb   :  { %1402 = vsyncpa [#allocation4 + $0x1], 1 }

</bundles_post_ra>
